<compile_context>
chip_gen: v7x
topology: tpu7x:2x2x1
jax: 0.10.0
libtpu: 0.0.40
codegen_flags: <defaults>
</compile_context>

<pallas_src>
import functools

import jax
import jax.numpy as jnp
from jax import lax
from jax.experimental import pallas as pl
from jax.experimental.pallas import tpu as pltpu

LN_EPS = 1e-6      # LayerNorm module default eps (spec: eps=1e-06)
LANE = 128         # TPU lane width
SUBLANE = 8        # TPU sublane width (f32)
TM_TARGET = 512    # row-tile target; sized well under v7x's 64 MiB VMEM


def _round_up(x, m):
    return -(-x // m) * m


# ---------------------------------------------------------------------------
# Pallas kernels
# ---------------------------------------------------------------------------
def _gemm_ln_kernel(x_ref, w_ref, g_ref, b_ref, out_ref, *, c_real, relu):
    """out = [relu]( LayerNorm_lastdim(x @ w) * g + b )   (lane-padded to 128).

    Padded weight/gamma/beta columns are zero, so y's padded lanes are exactly
    zero and the lane sums equal sums over the real `c_real` channels.
    """
    y = jnp.dot(x_ref[...], w_ref[...], preferred_element_type=jnp.float32)
    inv_c = 1.0 / c_real
    s1 = jnp.sum(y, axis=-1, keepdims=True)           # one-pass stats
    s2 = jnp.sum(y * y, axis=-1, keepdims=True)
    mean = s1 * inv_c
    var = jnp.maximum(s2 * inv_c - mean * mean, 0.0)
    y = (y - mean) * lax.rsqrt(var + LN_EPS)
    y = y * g_ref[...] + b_ref[...]                    # padded lanes -> 0
    if relu:
        y = jnp.maximum(y, 0.0)
    out_ref[...] = y


def _gemm_ln_res_kernel(x_ref, w_ref, g_ref, b_ref, res_ref, out_ref, *,
                        c_real, relu):
    """out = [relu]( LayerNorm_lastdim(x @ w) * g + b + residual )."""
    y = jnp.dot(x_ref[...], w_ref[...], preferred_element_type=jnp.float32)
    inv_c = 1.0 / c_real
    s1 = jnp.sum(y, axis=-1, keepdims=True)
    s2 = jnp.sum(y * y, axis=-1, keepdims=True)
    mean = s1 * inv_c
    var = jnp.maximum(s2 * inv_c - mean * mean, 0.0)
    y = (y - mean) * lax.rsqrt(var + LN_EPS)
    y = y * g_ref[...] + b_ref[...]
    y = y + res_ref[...]                               # residual padded with 0
    if relu:
        y = jnp.maximum(y, 0.0)
    out_ref[...] = y


def _pool_fc_kernel(x_ref, w_ref, b_ref, out_ref):
    """x: [N, HW, C] -> mean over HW -> [N, C] @ [C, out_padded] + bias."""
    feat = jnp.mean(x_ref[...], axis=1)
    out_ref[...] = jnp.dot(feat, w_ref[...],
                           preferred_element_type=jnp.float32) + b_ref[...]


# ---------------------------------------------------------------------------
# Glue: im2col + fused conv/LN wrapper
# ---------------------------------------------------------------------------
def _im2col(x, ksize, stride, pad):
    """x: [N, H, W, C] -> patches [N*Ho*Wo, ksize*ksize*C]."""
    N, H, W, C = x.shape
    xp = jnp.pad(x, ((0, 0), (pad, pad), (pad, pad), (0, 0)))
    Ho = (H + 2 * pad - ksize) // stride + 1
    Wo = (W + 2 * pad - ksize) // stride + 1
    cols = []
    for ky in range(ksize):
        for kx in range(ksize):
            cols.append(
                xp[:, ky:ky + (Ho - 1) * stride + 1:stride,
                      kx:kx + (Wo - 1) * stride + 1:stride, :])
    patches = jnp.concatenate(cols, axis=-1)
    return patches.reshape(N * Ho * Wo, ksize * ksize * C), (N, Ho, Wo)


def conv_ln(x_nhwc, w_hwio, gamma, beta, *, stride, relu, residual=None):
    """Conv2d (no bias) + channel LayerNorm (+ residual) (+ ReLU).

    Lowered to a row-tiled, pipelined, lane-dense Pallas GEMM+LN kernel.
    """
    kh, kw, cin, cout = w_hwio.shape
    pad = (kh - 1) // 2
    patches, (N, Ho, Wo) = _im2col(x_nhwc, kh, stride, pad)
    M, K = patches.shape
    Kp = _round_up(K, LANE)            # contraction dim -> full-width MXU
    Cp = _round_up(cout, LANE)         # lane-dense output channels
    tm = TM_TARGET if M >= TM_TARGET else _round_up(M, SUBLANE)
    Mp = _round_up(M, tm)
    grid_m = Mp // tm

    # MXU operands in bf16 (zero-padded); LN affine params / residual in f32.
    patches_p = jnp.pad(patches, ((0, Mp - M), (0, Kp - K))).astype(jnp.bfloat16)
    w_mat = jnp.pad(w_hwio.reshape(K, cout),
                    ((0, Kp - K), (0, Cp - cout))).astype(jnp.bfloat16)
    g = jnp.pad(gamma.reshape(1, cout).astype(jnp.float32),
                ((0, 0), (0, Cp - cout)))
    b = jnp.pad(beta.reshape(1, cout).astype(jnp.float32),
                ((0, 0), (0, Cp - cout)))

    in_specs = [
        pl.BlockSpec((tm, Kp), lambda i: (i, 0)),   # patches: streamed per tile
        pl.BlockSpec((Kp, Cp), lambda i: (0, 0)),   # weights: resident
        pl.BlockSpec((1, Cp), lambda i: (0, 0)),    # gamma:   resident
        pl.BlockSpec((1, Cp), lambda i: (0, 0)),    # beta:    resident
    ]
    args = [patches_p, w_mat, g, b]
    bytes_accessed = (patches_p.size * 2 + w_mat.size * 2 + 2 * Cp * 4
                      + Mp * Cp * 4)

    if residual is None:
        kern = functools.partial(_gemm_ln_kernel, c_real=cout, relu=relu)
    else:
        res = jnp.pad(residual.reshape(M, cout).astype(jnp.float32),
                      ((0, Mp - M), (0, Cp - cout)))
        args.append(res)
        in_specs.append(pl.BlockSpec((tm, Cp), lambda i: (i, 0)))
        bytes_accessed += res.size * 4
        kern = functools.partial(_gemm_ln_res_kernel, c_real=cout, relu=relu)

    y = pl.pallas_call(
        kern,
        out_shape=jax.ShapeDtypeStruct((Mp, Cp), jnp.float32),
        grid=(grid_m,),
        in_specs=in_specs,
        out_specs=pl.BlockSpec((tm, Cp), lambda i: (i, 0)),
        compiler_params=pltpu.CompilerParams(
            # Row tiles are independent -> megacore-parallel on v7x.
            dimension_semantics=("parallel",),
            # Explicit scoped-VMEM budget with headroom (v7x physical = 64 MiB).
            vmem_limit_bytes=32 * 1024 * 1024,
        ),
        cost_estimate=pl.CostEstimate(
            flops=2 * Mp * Kp * Cp,
            transcendentals=Mp,
            bytes_accessed=bytes_accessed,
        ),
    )(*args)
    return y[:M, :cout].reshape(N, Ho, Wo, cout)


# ---------------------------------------------------------------------------
# Model
# ---------------------------------------------------------------------------
def block_forward(x, p):
    """ResNet block: relu(LN(conv2(relu(LN(conv1(x))))) + shortcut)."""
    downsample = p['downsample']
    stride = 2 if downsample else 1
    out = conv_ln(x, p['w1'], p['g1'], p['b1'], stride=stride, relu=True)
    if downsample:
        shortcut = conv_ln(x, p['ws'], p['gs'], p['bs'], stride=2, relu=False)
    else:
        shortcut = x  # identity shortcut (f_in == f_out, stride 1)
    out = conv_ln(out, p['w2'], p['g2'], p['b2'], stride=1, relu=True,
                  residual=shortcut)
    return out


def model_forward(x_nchw, params):
    x = jnp.transpose(x_nchw, (0, 2, 3, 1))  # NCHW -> NHWC
    out = conv_ln(x, params['conv_w'], params['n_g'], params['n_b'],
                  stride=1, relu=True)
    for bp in params['blocks']:
        out = block_forward(out, bp)

    N, H, W, C = out.shape
    feat = out.reshape(N, H * W, C)
    n_out = params['fc_w'].shape[1]
    n_out_p = _round_up(n_out, LANE)                   # lane-dense fc output
    fc_w = jnp.pad(params['fc_w'], ((0, 0), (0, n_out_p - n_out)))
    fc_b = jnp.pad(params['fc_b'].reshape(1, n_out),
                   ((0, 0), (0, n_out_p - n_out)))
    vmem = pl.BlockSpec(memory_space=pltpu.MemorySpace.VMEM)
    logits = pl.pallas_call(
        _pool_fc_kernel,
        out_shape=jax.ShapeDtypeStruct((N, n_out_p), jnp.float32),
        in_specs=[vmem, vmem, vmem],
        out_specs=vmem,
    )(feat, fc_w, fc_b)
    return logits[:, :n_out]


def init_params(key, plan, outputs=10):
    keys = iter(jax.random.split(key, 128))

    def conv_w(cin, cout, k):
        fan_in = cin * k * k
        return (jax.random.normal(next(keys), (k, k, cin, cout), jnp.float32)
                * (2.0 / fan_in) ** 0.5)

    params = {}
    current = plan[0][0]
    params['conv_w'] = conv_w(3, current, 3)
    params['n_g'] = jnp.ones((current,), jnp.float32)
    params['n_b'] = jnp.zeros((current,), jnp.float32)

    blocks = []
    for seg_i, (filters, num_blocks) in enumerate(plan):
        for blk_i in range(num_blocks):
            downsample = seg_i > 0 and blk_i == 0
            bp = {
                'downsample': downsample,
                'w1': conv_w(current, filters, 3),
                'g1': jnp.ones((filters,), jnp.float32),
                'b1': jnp.zeros((filters,), jnp.float32),
                'w2': conv_w(filters, filters, 3),
                'g2': jnp.ones((filters,), jnp.float32),
                'b2': jnp.zeros((filters,), jnp.float32),
            }
            if downsample or current != filters:
                bp['ws'] = conv_w(current, filters, 1)
                bp['gs'] = jnp.ones((filters,), jnp.float32)
                bp['bs'] = jnp.zeros((filters,), jnp.float32)
            blocks.append(bp)
            current = filters
    params['blocks'] = blocks

    params['fc_w'] = (jax.random.normal(next(keys), (current, outputs), jnp.float32)
                      * (1.0 / current) ** 0.5)
    params['fc_b'] = jnp.zeros((outputs,), jnp.float32)
    return params


if __name__ == "__main__":
    key = jax.random.PRNGKey(0)
    k_x, k_p = jax.random.split(key)

    # Small CIFAR-like input: batch=2, 3 channels, 16x16 spatial.
    x = jax.random.normal(k_x, (2, 3, 16, 16), jnp.float32)

    # Small plan (one block per segment, widths 8/16/32), 10 outputs.
    plan = [(8, 1), (16, 1), (32, 1)]
    params = init_params(k_p, plan, outputs=10)

    logits = model_forward(x, params)
    jax.block_until_ready(logits)
    assert logits.shape == (2, 10) and logits.dtype == jnp.float32
    print("KERNEL_OK")
</pallas_src>

<mosaic_0001>
module attributes {stable_mosaic.version = 11 : i64} {
  func.func @_gemm_ln_kernel(%arg0: i32, %arg1: memref<512x128xbf16, #tpu.memory_space<vmem>>, %arg2: memref<128x128xbf16, #tpu.memory_space<vmem>>, %arg3: memref<1x128xf32, #tpu.memory_space<vmem>>, %arg4: memref<1x128xf32, #tpu.memory_space<vmem>>, %arg5: memref<512x128xf32, #tpu.memory_space<vmem>>) attributes {dimension_semantics = [#tpu.dimension_semantics<parallel>], iteration_bounds = array<i64: 1>, scalar_prefetch = 0 : i64, scratch_operands = 0 : i64, tpu.core_type = #tpu.core_type<tc>, window_params = [{transform_indices = @transform_0, window_bounds = array<i64: 512, 128>}, {pipeline_mode = #tpu.pipeline_mode<synchronous>, transform_indices = @transform_1, window_bounds = array<i64: 128, 128>}, {pipeline_mode = #tpu.pipeline_mode<synchronous>, transform_indices = @transform_2, window_bounds = array<i64: 1, 128>}, {pipeline_mode = #tpu.pipeline_mode<synchronous>, transform_indices = @transform_3, window_bounds = array<i64: 1, 128>}, {transform_indices = @transform_4, window_bounds = array<i64: 512, 128>}]} {
    %c0 = arith.constant 0 : index
    %c0_0 = arith.constant 0 : index
    %0 = vector.load %arg1[%c0, %c0_0] : memref<512x128xbf16, #tpu.memory_space<vmem>>, vector<512x128xbf16>
    %c0_1 = arith.constant 0 : index
    %c0_2 = arith.constant 0 : index
    %1 = vector.load %arg2[%c0_1, %c0_2] : memref<128x128xbf16, #tpu.memory_space<vmem>>, vector<128x128xbf16>
    %cst = arith.constant dense<0.000000e+00> : vector<512x128xf32>
    %2 = tpu.matmul %0, %1, %cst {dimension_numbers = #tpu.dot_dimension_numbers<[1], [0], [0], [1], [0, 0, 1, 1], [], []>} : vector<512x128xbf16>, vector<128x128xbf16>, vector<512x128xf32> -> vector<512x128xf32>
    %cst_3 = arith.constant dense<0.000000e+00> : vector<512xf32>
    %3 = vector.multi_reduction <add>, %2, %cst_3 [1] : vector<512x128xf32> to vector<512xf32>
    %4 = vector.shape_cast %3 : vector<512xf32> to vector<512x1xf32>
    %5 = arith.mulf %2, %2 : vector<512x128xf32>
    %cst_4 = arith.constant dense<0.000000e+00> : vector<512xf32>
    %6 = vector.multi_reduction <add>, %5, %cst_4 [1] : vector<512x128xf32> to vector<512xf32>
    %7 = vector.shape_cast %6 : vector<512xf32> to vector<512x1xf32>
    %cst_5 = arith.constant 1.250000e-01 : f32
    %8 = vector.broadcast %cst_5 : f32 to vector<512x1xf32>
    %9 = arith.mulf %4, %8 : vector<512x1xf32>
    %cst_6 = arith.constant 1.250000e-01 : f32
    %10 = vector.broadcast %cst_6 : f32 to vector<512x1xf32>
    %11 = arith.mulf %7, %10 : vector<512x1xf32>
    %12 = arith.mulf %9, %9 : vector<512x1xf32>
    %13 = arith.subf %11, %12 : vector<512x1xf32>
    %cst_7 = arith.constant 0.000000e+00 : f32
    %14 = vector.broadcast %cst_7 : f32 to vector<512x1xf32>
    %15 = arith.maximumf %13, %14 : vector<512x1xf32>
    %16 = vector.broadcast %9 : vector<512x1xf32> to vector<512x128xf32>
    %17 = arith.subf %2, %16 : vector<512x128xf32>
    %cst_8 = arith.constant 9.99999997E-7 : f32
    %18 = vector.broadcast %cst_8 : f32 to vector<512x1xf32>
    %19 = arith.addf %15, %18 : vector<512x1xf32>
    %20 = math.rsqrt %19 : vector<512x1xf32>
    %21 = vector.broadcast %20 : vector<512x1xf32> to vector<512x128xf32>
    %22 = arith.mulf %17, %21 : vector<512x128xf32>
    %c0_9 = arith.constant 0 : index
    %c0_10 = arith.constant 0 : index
    %23 = vector.load %arg3[%c0_9, %c0_10] : memref<1x128xf32, #tpu.memory_space<vmem>>, vector<1x128xf32>
    %24 = vector.broadcast %23 : vector<1x128xf32> to vector<512x128xf32>
    %25 = arith.mulf %22, %24 : vector<512x128xf32>
    %c0_11 = arith.constant 0 : index
    %c0_12 = arith.constant 0 : index
    %26 = vector.load %arg4[%c0_11, %c0_12] : memref<1x128xf32, #tpu.memory_space<vmem>>, vector<1x128xf32>
    %27 = vector.broadcast %26 : vector<1x128xf32> to vector<512x128xf32>
    %28 = arith.addf %25, %27 : vector<512x128xf32>
    %cst_13 = arith.constant 0.000000e+00 : f32
    %29 = vector.broadcast %cst_13 : f32 to vector<512x128xf32>
    %30 = arith.maximumf %28, %29 : vector<512x128xf32>
    %c0_14 = arith.constant 0 : index
    %c0_15 = arith.constant 0 : index
    %31 = vector.load %arg5[%c0_14, %c0_15] : memref<512x128xf32, #tpu.memory_space<vmem>>, vector<512x128xf32>
    tpu.vector_store %arg5[%c0_14, %c0_15], %30 {strides = array<i32>} : memref<512x128xf32, #tpu.memory_space<vmem>>, vector<512x128xf32>,
    return
  }
  func.func @transform_0(%arg0: i32) -> (i32, i32) {
    %c0_i32 = arith.constant 0 : i32
    %c0_i32_0 = arith.constant 0 : i32
    return %arg0, %c0_i32 : i32, i32
  }
  func.func @transform_1(%arg0: i32) -> (i32, i32) {
    %c0_i32 = arith.constant 0 : i32
    %c0_i32_0 = arith.constant 0 : i32
    %c0_i32_1 = arith.constant 0 : i32
    return %c0_i32, %c0_i32_0 : i32, i32
  }
  func.func @transform_2(%arg0: i32) -> (i32, i32) {
    %c0_i32 = arith.constant 0 : i32
    %c0_i32_0 = arith.constant 0 : i32
    %c0_i32_1 = arith.constant 0 : i32
    return %c0_i32, %c0_i32_0 : i32, i32
  }
  func.func @transform_3(%arg0: i32) -> (i32, i32) {
    %c0_i32 = arith.constant 0 : i32
    %c0_i32_0 = arith.constant 0 : i32
    %c0_i32_1 = arith.constant 0 : i32
    return %c0_i32, %c0_i32_0 : i32, i32
  }
  func.func @transform_4(%arg0: i32) -> (i32, i32) {
    %c0_i32 = arith.constant 0 : i32
    %c0_i32_0 = arith.constant 0 : i32
    return %arg0, %c0_i32 : i32, i32
  }
}

</mosaic_0001>

<bundles_post_ra>
// kernel: tpu_custom_call.1
= control target key start
LH: loop header
LB: loop body
LE: loop exit
PB: predicated region body
PF: predicated region fallthrough
CT: control target
= control target key end

     0   :  { %9 = vsyncpa [#allocation3], 0  ;;  %s3214_s0 = inlined_call_operand.hbm [shape: bf16[512,128], index: 0, kind: input, shape index: {}]   ;;  %s3215_s1 = inlined_call_operand.hbm [shape: bf16[128,128], index: 1, kind: input, shape index: {}]   ;;  %s3216_s2 = inlined_call_operand.vmem [shape: f32[1,128], index: 2, kind: input, shape index: {}]   ;;  %s3217_s3 = inlined_call_operand.vmem [shape: f32[1,128], index: 3, kind: input, shape index: {}]   ;;  %s3218_s4 = inlined_call_operand.hbm [shape: f32[512,128], index: 4, kind: output, shape index: {}]  }
   0x1   :  { %10 = vsyncpa [#allocation6], 0 }
   0x2   :  { %11 = vsyncpa [#allocation4], 0  ;;  %s2267_s15 = smov [#allocation2]   ;;  %s2195_s19 = scalar_lea.hbm %s3214_s0, 4096 }
   0x3   :  { %s17_s16 = sshll.u32 %s2267_s15, 4  ;;  %p2196_p0 = scmp.ne.s32.totalorder %s3214_s0, %s2195_s19  ;;  %s18_s16 = int_to_ptr.vmem [resolvable:$true] %s17_s16 }
   0x4   :  { %p2199_p1 = scmp.lt.u32.totalorder %s2195_s19, %s3214_s0 }
   0x6   :  { %p2201_p2 = pnand %p2199_p1, %p2196_p0 }
   0x8   :  { %2204 = shalt.err (!%p2201_p2)
}
   0x9   :  { %s2205_s24 = scalar_lea.vmem %s18_s16, 4096  ;;  %p2210_p4 = scmp.lt.s32.totalorder %s18_s16, %s18_s16 }
   0xa   :  { %p2206_p3 = scmp.ne.s32.totalorder %s18_s16, %s2205_s24  ;;  %p2211_p5 = scmp.lt.s32.totalorder %s2205_s24, %s2205_s24 }
   0xc   :  { %p2212_p6 = por %p2211_p5, %p2210_p4 }
   0xe   :  { %p2213_p7 = pnand %p2212_p6, %p2206_p3 }
  0x10   :  { %2216 = shalt.err (!%p2213_p7)
}
  0x11   :  { %s2268_s25 = smov 64   ;;  %s2269_s26 = smov 4  }
  0x12   :  { %23 = dma.hbm_to_vmem [thread:$0]  %s3214_s0, 4096, %s18_s16, [#allocation3], %s2268_s25, %s2268_s25, %s2269_s26  }
  0x13   :  { %s2270_s29 = smov [#allocation5]   ;;  %s2217_s7 = scalar_lea.hbm %s3215_s1, 1024 }
  0x14   :  { %s29_s30 = sshll.u32 %s2270_s29, 4  ;;  %p2218_p8 = scmp.ne.s32.totalorder %s3215_s1, %s2217_s7  ;;  %s30_s30 = int_to_ptr.vmem [resolvable:$true] %s29_s30 }
  0x15   :  { %p2221_p9 = scmp.lt.u32.totalorder %s2217_s7, %s3215_s1 }
  0x17   :  { %p2223_p10 = pnand %p2221_p9, %p2218_p8 }
  0x19   :  { %2226 = shalt.err (!%p2223_p10)
}
  0x1a   :  { %s2227_s12 = scalar_lea.vmem %s30_s30, 1024  ;;  %p2232_p12 = scmp.lt.s32.totalorder %s30_s30, %s30_s30 }
  0x1b   :  { %p2228_p11 = scmp.ne.s32.totalorder %s30_s30, %s2227_s12  ;;  %p2233_p13 = scmp.lt.s32.totalorder %s2227_s12, %s2227_s12 }
  0x1d   :  { %p2234_p0 = por %p2233_p13, %p2232_p12 }
  0x1f   :  { %p2235_p1 = pnand %p2234_p0, %p2228_p11 }
  0x21   :  { %2238 = shalt.err (!%p2235_p1)
}
  0x22   :  { %35 = dma.hbm_to_vmem [thread:$0]  %s3215_s1, 1024, %s30_s30, [#allocation6], %s2268_s25, %s2268_s25, %s2269_s26  }
  0x23   :  { %2261 = dma.done.wait [#allocation3], 4096  }
  0x24   :  { %2262 = vsyncadd [#allocation3], 4294963200 }
  0x25   :  { %2263 = dma.done.wait [#allocation6], 1024  }
  0x26   :  { %2264 = vsyncadd [#allocation6], 4294966272  ;;  %v2025_v0 = vld [vmem:[#allocation5] sm:$0xff]   ;;  %v2026_v1 = vld [vmem:[#allocation5 + $0x8] sm:$0xff]  }
  0x27   :  { %1922 = vmatprep.subr.bf16.mxu0 %v2025_v0  ;;  %2002 = vmatprep.subr.bf16.mxu1 %v2025_v0  ;;  %v2027_v2 = vld [vmem:[#allocation5 + $0x10] sm:$0xff]   ;;  %v2028_v3 = vld [vmem:[#allocation5 + $0x18] sm:$0xff]   ;;  %v2033_v4 = vld [vmem:[#allocation2] sm:$0xff]  }
  0x28   :  { %1923 = vmatpush3.bf16.msra.mxu0 %v2025_v0  ;;  %2010 = vmatpush3.bf16.msra.mxu1 %v2025_v0  ;;  %v2034_v5 = vld [vmem:[#allocation2 + $0x80] sm:$0xff]   ;;  %v2030_v7 = vld [vmem:[#allocation5 + $0x28] sm:$0xff]   ;;  %v2031_v8 = vld [vmem:[#allocation5 + $0x30] sm:$0xff]  }
  0x29   :  { %1924 = vmatprep.subr.bf16.mxu0 %v2026_v1  ;;  %2003 = vmatprep.subr.bf16.mxu1 %v2026_v1  ;;  %v2029_v6 = vld [vmem:[#allocation5 + $0x20] sm:$0xff]   ;;  %v2032_v9 = vld [vmem:[#allocation5 + $0x38] sm:$0xff]   ;;  %v2035_v10 = vld [vmem:[#allocation2 + $0x8] sm:$0xff]  }
  0x2a   :  { %1938 = vmatprep.mubr.bf16.mxu0 %v2033_v4  ;;  %1970 = vmatprep.mubr.bf16.mxu1 %v2034_v5  ;;  %v2036_v11 = vld [vmem:[#allocation2 + $0x88] sm:$0xff]   ;;  %v2037_v12 = vld [vmem:[#allocation2 + $0x10] sm:$0xff]   ;;  %v2038_v14 = vld [vmem:[#allocation2 + $0x18] sm:$0xff]  }
  0x2b   :  { %v2039_v13 = vld [vmem:[#allocation2 + $0x90] sm:$0xff]   ;;  %v2040_v15 = vld [vmem:[#allocation2 + $0x98] sm:$0xff]   ;;  %v2041_v16 = vld [vmem:[#allocation2 + $0x20] sm:$0xff]  }
  0x2c   :  { %1925 = vmatpush3.bf16.msra.mxu0 %v2026_v1  ;;  %2011 = vmatpush3.bf16.msra.mxu1 %v2026_v1  ;;  %v2043_v17 = vld [vmem:[#allocation2 + $0xa0] sm:$0xff]   ;;  %v2042_v18 = vld [vmem:[#allocation2 + $0x28] sm:$0xff]   ;;  %v2045_v20 = vld [vmem:[#allocation2 + $0x30] sm:$0xff]  }
  0x2d   :  { %1926 = vmatprep.subr.bf16.mxu0 %v2027_v2  ;;  %2004 = vmatprep.subr.bf16.mxu1 %v2027_v2  ;;  %v2044_v19 = vld [vmem:[#allocation2 + $0xa8] sm:$0xff]   ;;  %v2047_v21 = vld [vmem:[#allocation2 + $0xb0] sm:$0xff]   ;;  %v2046_v22 = vld [vmem:[#allocation2 + $0x38] sm:$0xff]  }
  0x2e   :  { %v2048_v23 = vld [vmem:[#allocation2 + $0xb8] sm:$0xff]   ;;  %v2049_v24 = vld [vmem:[#allocation2 + $0x40] sm:$0xff]   ;;  %v2050_v26 = vld [vmem:[#allocation2 + $0x48] sm:$0xff]  }
  0x2f   :  { %v2051_v25 = vld [vmem:[#allocation2 + $0xc0] sm:$0xff]   ;;  %v2052_v27 = vld [vmem:[#allocation2 + $0xc8] sm:$0xff]   ;;  %v2053_v28 = vld [vmem:[#allocation2 + $0x50] sm:$0xff]  }
  0x30   :  { %1927 = vmatpush3.bf16.msra.mxu0 %v2027_v2  ;;  %2012 = vmatpush3.bf16.msra.mxu1 %v2027_v2  ;;  %v2055_v29 = vld [vmem:[#allocation2 + $0xd0] sm:$0xff]   ;;  %v2054_v30 = vld [vmem:[#allocation2 + $0x58] sm:$0xff]   ;;  %v2057_v32 = vld [vmem:[#allocation2 + $0x60] sm:$0xff]  }
  0x31   :  { %1928 = vmatprep.subr.bf16.mxu0 %v2028_v3  ;;  %2005 = vmatprep.subr.bf16.mxu1 %v2028_v3  ;;  %v2056_v31 = vld [vmem:[#allocation2 + $0xd8] sm:$0xff]   ;;  %v2059_v33 = vld [vmem:[#allocation2 + $0xe0] sm:$0xff]   ;;  %v2058_v34 = vld [vmem:[#allocation2 + $0x68] sm:$0xff]  }
  0x32   :  { %v2060_v35 = vld [vmem:[#allocation2 + $0xe8] sm:$0xff]   ;;  %v2061_v36 = vld [vmem:[#allocation2 + $0x70] sm:$0xff]   ;;  %v2062_v37 = vld [vmem:[#allocation2 + $0x78] sm:$0xff]  }
  0x33   :  { %v2063_v38 = vld [vmem:[#allocation2 + $0xf0] sm:$0xff]   ;;  %v2064_v39 = vld [vmem:[#allocation2 + $0xf8] sm:$0xff]  }
  0x34   :  { %1929 = vmatpush3.bf16.msra.mxu0 %v2028_v3  ;;  %2013 = vmatpush3.bf16.msra.mxu1 %v2028_v3 }
  0x35   :  { %1930 = vmatprep.subr.bf16.mxu0 %v2029_v6  ;;  %2006 = vmatprep.subr.bf16.mxu1 %v2029_v6 }
  0x38   :  { %1931 = vmatpush3.bf16.msra.mxu0 %v2029_v6  ;;  %2014 = vmatpush3.bf16.msra.mxu1 %v2029_v6 }
  0x39   :  { %1932 = vmatprep.subr.bf16.mxu0 %v2030_v7  ;;  %2007 = vmatprep.subr.bf16.mxu1 %v2030_v7 }
  0x3c   :  { %1933 = vmatpush3.bf16.msra.mxu0 %v2030_v7  ;;  %2015 = vmatpush3.bf16.msra.mxu1 %v2030_v7 }
  0x3d   :  { %1934 = vmatprep.subr.bf16.mxu0 %v2031_v8  ;;  %2008 = vmatprep.subr.bf16.mxu1 %v2031_v8 }
  0x40   :  { %1935 = vmatpush3.bf16.msra.mxu0 %v2031_v8  ;;  %2016 = vmatpush3.bf16.msra.mxu1 %v2031_v8 }
  0x41   :  { %1936 = vmatprep.subr.bf16.mxu0 %v2032_v9  ;;  %2009 = vmatprep.subr.bf16.mxu1 %v2032_v9 }
  0x44   :  { %1937 = vmatpush3.bf16.msra.mxu0 %v2032_v9  ;;  %2017 = vmatpush3.bf16.msra.mxu1 %v2032_v9 }
  0x47   :  { %1939 = vmatmul.mubr.bf16.vlgmr.msra.gmra.mrb[0].mxu0 %v2035_v10  ;;  %1971 = vmatmul.mubr.bf16.vlgmr.msra.gmra.mrb[0].mxu1 %v2036_v11 }
  0x48   :  { %1942 = vmatprep.mubr.bf16.mxu0 %v2037_v12  ;;  %1974 = vmatprep.mubr.bf16.mxu1 %v2039_v13 }
  0x4f   :  { %1943 = vmatmul.mubr.bf16.gmra.mrb[4].mxu0 %v2038_v14  ;;  %1975 = vmatmul.mubr.bf16.gmra.mrb[4].mxu1 %v2040_v15 }
  0x50   :  { %1946 = vmatprep.mubr.bf16.mxu0 %v2041_v16  ;;  %1978 = vmatprep.mubr.bf16.mxu1 %v2043_v17 }
  0x57   :  { %1947 = vmatmul.mubr.bf16.gmra.mrb[8].mxu0 %v2042_v18  ;;  %1979 = vmatmul.mubr.bf16.gmra.mrb[8].mxu1 %v2044_v19 }
  0x58   :  { %1950 = vmatprep.mubr.bf16.mxu0 %v2045_v20  ;;  %1982 = vmatprep.mubr.bf16.mxu1 %v2047_v21 }
  0x5f   :  { %1951 = vmatmul.mubr.bf16.gmra.mrb[12].mxu0 %v2046_v22  ;;  %1983 = vmatmul.mubr.bf16.gmra.mrb[12].mxu1 %v2048_v23 }
  0x60   :  { %1954 = vmatprep.mubr.bf16.mxu0 %v2049_v24  ;;  %1986 = vmatprep.mubr.bf16.mxu1 %v2051_v25 }
  0x67   :  { %1955 = vmatmul.mubr.bf16.gmra.mrb[16].mxu0 %v2050_v26  ;;  %1987 = vmatmul.mubr.bf16.gmra.mrb[16].mxu1 %v2052_v27 }
  0x68   :  { %1958 = vmatprep.mubr.bf16.mxu0 %v2053_v28  ;;  %1990 = vmatprep.mubr.bf16.mxu1 %v2055_v29 }
  0x6f   :  { %1959 = vmatmul.mubr.bf16.gmra.mrb[20].mxu0 %v2054_v30  ;;  %1991 = vmatmul.mubr.bf16.gmra.mrb[20].mxu1 %v2056_v31 }
  0x70   :  { %1962 = vmatprep.mubr.bf16.mxu0 %v2057_v32  ;;  %1994 = vmatprep.mubr.bf16.mxu1 %v2059_v33 }
  0x77   :  { %1963 = vmatmul.mubr.bf16.gmra.mrb[24].mxu0 %v2058_v34  ;;  %1995 = vmatmul.mubr.bf16.gmra.mrb[24].mxu1 %v2060_v35 }
  0x78   :  { %1966 = vmatprep.mubr.bf16.mxu0 %v2061_v36  ;;  %1998 = vmatprep.mubr.bf16.mxu1 %v2063_v38 }
  0x7f   :  { %1967 = vmatmul.mubr.bf16.gmra.mrb[28].mxu0 %v2062_v37  ;;  %1999 = vmatmul.mubr.bf16.gmra.mrb[28].mxu1 %v2064_v39 }
 0x11a   :  { %v2323_v40 = vpop.f32.mrb[0].mxu0  ;;  %v2325_v41 = vpop.f32.mrb[0].mxu1 }
 0x11b   :  { %724 = vadd.xlane.f32.xlu0 %v2325_v41  ;;  %v2328_v42 = vpop.f32.mrb[1].mxu1  ;;  %660 = vadd.xlane.f32.xlu1 %v2323_v40  ;;  %v2331_v43 = vpop.f32.mrb[1].mxu0  ;;  %v786_v54 = vmul.f32 %v2323_v40, %v2323_v40  ;;  %v818_v57 = vmul.f32 %v2325_v41, %v2325_v41 }
 0x11c   :  { %v2333_v44 = vpop.f32.mrb[2].mxu0  ;;  %v2335_v45 = vpop.f32.mrb[2].mxu1  ;;  %v784_v4 = vmul.f32 %v2331_v43, %v2331_v43  ;;  %v816_v12 = vmul.f32 %v2328_v42, %v2328_v42 }
 0x11d   :  { %v2337_v46 = vpop.f32.mrb[3].mxu0  ;;  %v2339_v47 = vpop.f32.mrb[3].mxu1  ;;  %v787_v58 = vmul.f32 %v2333_v44, %v2333_v44  ;;  %v819_v1 = vmul.f32 %v2335_v45, %v2335_v45 }
 0x11e   :  { %v785_v5 = vmul.f32 %v2337_v46, %v2337_v46  ;;  %v817_v13 = vmul.f32 %v2339_v47, %v2339_v47 }
 0x11f   :  { %656 = vadd.xlane.f32.xlu0 %v2331_v43  ;;  %662 = vadd.xlane.f32.xlu1 %v2333_v44 }
 0x122   :  { %v2343_v48 = vpop.f32.mrb[4].mxu0  ;;  %v2345_v49 = vpop.f32.mrb[4].mxu1 }
 0x123   :  { %720 = vadd.xlane.f32.xlu0 %v2328_v42  ;;  %726 = vadd.xlane.f32.xlu1 %v2335_v45  ;;  %v2349_v50 = vpop.f32.mrb[5].mxu0  ;;  %v2351_v51 = vpop.f32.mrb[5].mxu1  ;;  %v790_v32 = vmul.f32 %v2343_v48, %v2343_v48  ;;  %v822_v34 = vmul.f32 %v2345_v49, %v2345_v49 }
 0x124   :  { %v2353_v52 = vpop.f32.mrb[6].mxu0  ;;  %v2355_v53 = vpop.f32.mrb[6].mxu1  ;;  %v788_v36 = vmul.f32 %v2349_v50, %v2349_v50  ;;  %v820_v38 = vmul.f32 %v2351_v51, %v2351_v51 }
 0x125   :  { %v2359_v55 = vpop.f32.mrb[7].mxu0  ;;  %v2361_v56 = vpop.f32.mrb[7].mxu1  ;;  %v791_v33 = vmul.f32 %v2353_v52, %v2353_v52  ;;  %v823_v35 = vmul.f32 %v2355_v53, %v2355_v53 }
 0x126   :  { %v789_v37 = vmul.f32 %v2359_v55, %v2359_v55  ;;  %v821_v39 = vmul.f32 %v2361_v56, %v2361_v56 }
 0x127   :  { %852 = vadd.xlane.f32.xlu0 %v786_v54  ;;  %722 = vadd.xlane.f32.xlu1 %v2339_v47 }
 0x12a   :  { %v2368_v59 = vpop.f32.mrb[8].mxu0  ;;  %v2370_v60 = vpop.f32.mrb[8].mxu1 }
 0x12b   :  { %3247 = vst [vmem:[#allocation11_spill] sm:$0xff] %v2368_v59  ;;  %3248 = vst [vmem:[#allocation12_spill] sm:$0xff] %v2370_v60  ;;  %916 = vadd.xlane.f32.xlu0 %v818_v57  ;;  %854 = vadd.xlane.f32.xlu1 %v787_v58  ;;  %v2372_v61 = vpop.f32.mrb[9].mxu0  ;;  %v2374_v62 = vpop.f32.mrb[9].mxu1 }
 0x12c   :  { %3249 = vst [vmem:[#allocation13_spill] sm:$0xff] %v2372_v61  ;;  %3250 = vst [vmem:[#allocation14_spill] sm:$0xff] %v2374_v62  ;;  %v2376_v63 = vpop.f32.mrb[10].mxu0  ;;  %v2378_v0 = vpop.f32.mrb[10].mxu1 }
 0x12d   :  { %3251 = vst [vmem:[#allocation15_spill] sm:$0xff] %v2376_v63  ;;  %3252 = vst [vmem:[#allocation16_spill] sm:$0xff] %v2378_v0  ;;  %v2382_v2 = vpop.f32.mrb[11].mxu0  ;;  %v2384_v3 = vpop.f32.mrb[11].mxu1 }
 0x12e   :  { %3253 = vst [vmem:[#allocation17_spill] sm:$0xff] %v2382_v2  ;;  %3254 = vst [vmem:[#allocation18_spill] sm:$0xff] %v2384_v3 }
 0x12f   :  { %918 = vadd.xlane.f32.xlu1 %v819_v1  ;;  %658 = vadd.xlane.f32.xlu0 %v2337_v46 }
 0x132   :  { %v2391_v6 = vpop.f32.mrb[12].mxu0  ;;  %v2393_v7 = vpop.f32.mrb[12].mxu1 }
 0x133   :  { %3255 = vst [vmem:[#allocation19_spill] sm:$0xff] %v2391_v6  ;;  %3256 = vst [vmem:[#allocation20_spill] sm:$0xff] %v2393_v7  ;;  %848 = vadd.xlane.f32.xlu0 %v784_v4  ;;  %850 = vadd.xlane.f32.xlu1 %v785_v5  ;;  %v2395_v8 = vpop.f32.mrb[13].mxu0  ;;  %v2397_v9 = vpop.f32.mrb[13].mxu1 }
 0x134   :  { %3257 = vst [vmem:[#allocation21_spill] sm:$0xff] %v2395_v8  ;;  %3258 = vst [vmem:[#allocation22_spill] sm:$0xff] %v2397_v9  ;;  %v2399_v10 = vpop.f32.mrb[14].mxu0  ;;  %v2401_v11 = vpop.f32.mrb[14].mxu1 }
 0x135   :  { %3259 = vst [vmem:[#allocation23_spill] sm:$0xff] %v2399_v10  ;;  %3260 = vst [vmem:[#allocation24_spill] sm:$0xff] %v2401_v11  ;;  %v2407_v14 = vpop.f32.mrb[15].mxu0  ;;  %v2409_v15 = vpop.f32.mrb[15].mxu1 }
 0x136   :  { %3261 = vst [vmem:[#allocation25_spill] sm:$0xff] %v2407_v14  ;;  %3262 = vst [vmem:[#allocation26_spill] sm:$0xff] %v2409_v15 }
 0x137   :  { %912 = vadd.xlane.f32.xlu0 %v816_v12  ;;  %914 = vadd.xlane.f32.xlu1 %v817_v13 }
 0x13a   :  { %v2411_v16 = vpop.f32.mrb[16].mxu0  ;;  %v2413_v17 = vpop.f32.mrb[16].mxu1 }
 0x13b   :  { %3263 = vst [vmem:[#allocation27_spill] sm:$0xff] %v2411_v16  ;;  %3264 = vst [vmem:[#allocation28_spill] sm:$0xff] %v2413_v17  ;;  %668 = vadd.xlane.f32.xlu0 %v2343_v48  ;;  %670 = vadd.xlane.f32.xlu1 %v2353_v52  ;;  %v2417_v18 = vpop.f32.mrb[17].mxu0  ;;  %v2419_v19 = vpop.f32.mrb[17].mxu1 }
 0x13c   :  { %3265 = vst [vmem:[#allocation29_spill] sm:$0xff] %v2417_v18  ;;  %3266 = vst [vmem:[#allocation30_spill] sm:$0xff] %v2419_v19  ;;  %v2421_v20 = vpop.f32.mrb[18].mxu0  ;;  %v2423_v21 = vpop.f32.mrb[18].mxu1 }
 0x13d   :  { %3267 = vst [vmem:[#allocation31_spill] sm:$0xff] %v2421_v20  ;;  %3268 = vst [vmem:[#allocation32_spill] sm:$0xff] %v2423_v21  ;;  %v2425_v22 = vpop.f32.mrb[19].mxu0  ;;  %v2427_v23 = vpop.f32.mrb[19].mxu1 }
 0x13e   :  { %3269 = vst [vmem:[#allocation33_spill] sm:$0xff] %v2425_v22  ;;  %3270 = vst [vmem:[#allocation34_spill] sm:$0xff] %v2427_v23 }
 0x13f   :  { %732 = vadd.xlane.f32.xlu0 %v2345_v49  ;;  %734 = vadd.xlane.f32.xlu1 %v2355_v53 }
 0x142   :  { %v2431_v24 = vpop.f32.mrb[20].mxu0  ;;  %v2433_v25 = vpop.f32.mrb[20].mxu1 }
 0x143   :  { %3271 = vst [vmem:[#allocation35_spill] sm:$0xff] %v2431_v24  ;;  %664 = vadd.xlane.f32.xlu0 %v2349_v50  ;;  %666 = vadd.xlane.f32.xlu1 %v2359_v55  ;;  %v2437_v26 = vpop.f32.mrb[21].mxu0  ;;  %v2439_v27 = vpop.f32.mrb[21].mxu1 }
 0x144   :  { %v2441_v28 = vpop.f32.mrb[22].mxu0  ;;  %v2443_v29 = vpop.f32.mrb[22].mxu1 }
 0x145   :  { %3272 = vst [vmem:[#allocation36_spill] sm:$0xff] %v2441_v28  ;;  %v2445_v30 = vpop.f32.mrb[23].mxu0  ;;  %v2447_v31 = vpop.f32.mrb[23].mxu1 }
 0x147   :  { %728 = vadd.xlane.f32.xlu0 %v2351_v51  ;;  %730 = vadd.xlane.f32.xlu1 %v2361_v56 }
 0x14a   :  { %v2467_v54 = vpop.f32.mrb[24].mxu0  ;;  %v2475_v4 = vpop.f32.mrb[24].mxu1 }
 0x14b   :  { %860 = vadd.xlane.f32.xlu0 %v790_v32  ;;  %862 = vadd.xlane.f32.xlu1 %v791_v33  ;;  %v2469_v57 = vpop.f32.mrb[25].mxu0  ;;  %v2479_v5 = vpop.f32.mrb[25].mxu1  ;;  %v794_v32 = vmul.f32 %v2368_v59, %v2368_v59  ;;  %v795_v33 = vmul.f32 %v2376_v63, %v2376_v63 }
 0x14c   :  { %v2471_v58 = vpop.f32.mrb[26].mxu0  ;;  %v2481_v12 = vpop.f32.mrb[26].mxu1 }
 0x14d   :  { %v2473_v1 = vpop.f32.mrb[27].mxu0  ;;  %v2483_v13 = vpop.f32.mrb[27].mxu1 }
 0x14f   :  { %924 = vadd.xlane.f32.xlu0 %v822_v34  ;;  %926 = vadd.xlane.f32.xlu1 %v823_v35  ;;  %v826_v34 = vmul.f32 %v2370_v60, %v2370_v60  ;;  %v827_v35 = vmul.f32 %v2378_v0, %v2378_v0 }
 0x153   :  { %856 = vadd.xlane.f32.xlu0 %v788_v36  ;;  %858 = vadd.xlane.f32.xlu1 %v789_v37  ;;  %v792_v36 = vmul.f32 %v2372_v61, %v2372_v61  ;;  %v793_v37 = vmul.f32 %v2382_v2, %v2382_v2 }
 0x157   :  { %920 = vadd.xlane.f32.xlu0 %v820_v38  ;;  %922 = vadd.xlane.f32.xlu1 %v821_v39  ;;  %v824_v38 = vmul.f32 %v2374_v62, %v2374_v62  ;;  %v825_v39 = vmul.f32 %v2384_v3, %v2384_v3 }
 0x15b   :  { %676 = vadd.xlane.f32.xlu0 %v2368_v59  ;;  %678 = vadd.xlane.f32.xlu1 %v2376_v63 }
 0x15f   :  { %740 = vadd.xlane.f32.xlu0 %v2370_v60  ;;  %742 = vadd.xlane.f32.xlu1 %v2378_v0  ;;  %v796_v0 = vmul.f32 %v2395_v8, %v2395_v8  ;;  %v797_v60 = vmul.f32 %v2407_v14, %v2407_v14 }
 0x163   :  { %672 = vadd.xlane.f32.xlu0 %v2372_v61  ;;  %674 = vadd.xlane.f32.xlu1 %v2382_v2  ;;  %v2515_v61 = vpop.f32.mrb[28].mxu1  ;;  %v831_v2 = vmul.f32 %v2401_v11, %v2401_v11 }
 0x167   :  { %736 = vadd.xlane.f32.xlu0 %v2374_v62  ;;  %738 = vadd.xlane.f32.xlu1 %v2384_v3  ;;  %v830_v62 = vmul.f32 %v2393_v7, %v2393_v7 }
 0x16b   :  { %868 = vadd.xlane.f32.xlu0 %v794_v32  ;;  %870 = vadd.xlane.f32.xlu1 %v795_v33  ;;  %v2507_v32 = vpop.f32.mrb[28].mxu0 }
 0x16c   :  { %v2509_v33 = vpop.f32.mrb[29].mxu0 }
 0x16f   :  { %932 = vadd.xlane.f32.xlu0 %v826_v34  ;;  %934 = vadd.xlane.f32.xlu1 %v827_v35  ;;  %v2511_v34 = vpop.f32.mrb[30].mxu0 }
 0x170   :  { %v2513_v35 = vpop.f32.mrb[31].mxu0 }
 0x173   :  { %864 = vadd.xlane.f32.xlu0 %v792_v36  ;;  %866 = vadd.xlane.f32.xlu1 %v793_v37  ;;  %v2519_v36 = vpop.f32.mrb[29].mxu1 }
 0x174   :  { %3273 = vst [vmem:[#allocation37_spill] sm:$0xff] %v2519_v36  ;;  %v2521_v37 = vpop.f32.mrb[30].mxu1 }
 0x175   :  { %v2523_v3 = vpop.f32.mrb[31].mxu1 }
 0x176   :  { %3274 = vst [vmem:[#allocation38_spill] sm:$0xff] %v2523_v3 }
 0x177   :  { %928 = vadd.xlane.f32.xlu0 %v824_v38  ;;  %930 = vadd.xlane.f32.xlu1 %v825_v39  ;;  %v798_v38 = vmul.f32 %v2391_v6, %v2391_v6  ;;  %v799_v39 = vmul.f32 %v2399_v10, %v2399_v10 }
 0x17b   :  { %684 = vadd.xlane.f32.xlu0 %v2391_v6  ;;  %686 = vadd.xlane.f32.xlu1 %v2399_v10 }
 0x17f   :  { %748 = vadd.xlane.f32.xlu0 %v2393_v7  ;;  %750 = vadd.xlane.f32.xlu1 %v2401_v11 }
 0x183   :  { %680 = vadd.xlane.f32.xlu0 %v2395_v8  ;;  %682 = vadd.xlane.f32.xlu1 %v2407_v14 }
 0x187   :  { %744 = vadd.xlane.f32.xlu0 %v2397_v9  ;;  %746 = vadd.xlane.f32.xlu1 %v2409_v15 }
 0x18b   :  { %876 = vadd.xlane.f32.xlu0 %v798_v38  ;;  %878 = vadd.xlane.f32.xlu1 %v799_v39  ;;  %v828_v38 = vmul.f32 %v2397_v9, %v2397_v9  ;;  %v829_v39 = vmul.f32 %v2409_v15, %v2409_v15  ;;  %v834_v15 = vmul.f32 %v2413_v17, %v2413_v17 }
 0x18c   :  { %v835_v9 = vmul.f32 %v2423_v21, %v2423_v21 }
 0x18f   :  { %940 = vadd.xlane.f32.xlu0 %v830_v62  ;;  %942 = vadd.xlane.f32.xlu1 %v831_v2  ;;  %v803_v2 = vmul.f32 %v2421_v20, %v2421_v20 }
 0x193   :  { %872 = vadd.xlane.f32.xlu0 %v796_v0  ;;  %874 = vadd.xlane.f32.xlu1 %v797_v60  ;;  %v802_v0 = vmul.f32 %v2411_v16, %v2411_v16 }
 0x197   :  { %936 = vadd.xlane.f32.xlu0 %v828_v38  ;;  %938 = vadd.xlane.f32.xlu1 %v829_v39 }
 0x19b   :  { %692 = vadd.xlane.f32.xlu0 %v2411_v16  ;;  %694 = vadd.xlane.f32.xlu1 %v2421_v20  ;;  %v800_v16 = vmul.f32 %v2417_v18, %v2417_v18 }
 0x19f   :  { %756 = vadd.xlane.f32.xlu0 %v2413_v17  ;;  %758 = vadd.xlane.f32.xlu1 %v2423_v21 }
 0x1a3   :  { %688 = vadd.xlane.f32.xlu0 %v2417_v18  ;;  %690 = vadd.xlane.f32.xlu1 %v2425_v22  ;;  %v833_v18 = vmul.f32 %v2427_v23, %v2427_v23 }
 0x1a7   :  { %752 = vadd.xlane.f32.xlu0 %v2419_v19  ;;  %754 = vadd.xlane.f32.xlu1 %v2427_v23 }
 0x1a8   :  { %v725_v60 = vpop.xlane.xlu0 %724  ;;  %v661_v62 = vpop.xlane.xlu1 %660 }
 0x1a9   :  { %v2563_v11 = vmul.f32 0.125, %v661_v62  ;;  %v832_v62 = vmul.f32 %v2419_v19, %v2419_v19 }
 0x1ab   :  { %884 = vadd.xlane.f32.xlu0 %v802_v0  ;;  %886 = vadd.xlane.f32.xlu1 %v803_v2  ;;  %v801_v0 = vmul.f32 %v2425_v22, %v2425_v22  ;;  %v2569_v2 = vmul.f32 0.125, %v725_v60 }
 0x1ac   :  { %v657_v38 = vpop.xlane.xlu0 %656  ;;  %v663_v39 = vpop.xlane.xlu1 %662 }
 0x1af   :  { %948 = vadd.xlane.f32.xlu0 %v834_v15  ;;  %950 = vadd.xlane.f32.xlu1 %v835_v9  ;;  %v1106_v15 = vmul.f32 %v2563_v11, %v2563_v11  ;;  %v2573_v9 = vmul.f32 0.125, %v663_v39 }
 0x1b0   :  { %v721_v14 = vpop.xlane.xlu0 %720  ;;  %v727_v8 = vpop.xlane.xlu1 %726 }
 0x1b1   :  { %v2581_v60 = vmul.f32 0.125, %v727_v8  ;;  %v1107_v39 = vmul.f32 %v2573_v9, %v2573_v9 }
 0x1b3   :  { %880 = vadd.xlane.f32.xlu0 %v800_v16  ;;  %882 = vadd.xlane.f32.xlu1 %v801_v0  ;;  %v1138_v16 = vmul.f32 %v2569_v2, %v2569_v2  ;;  %v1139_v8 = vmul.f32 %v2581_v60, %v2581_v60 }
 0x1b4   :  { %v853_v17 = vpop.xlane.xlu0 %852  ;;  %v723_v20 = vpop.xlane.xlu1 %722 }
 0x1b5   :  { %v1042_v21 = vmul.f32 0.125, %v853_v17 }
 0x1b7   :  { %v1170_v7 = vsub.f32 %v1042_v21, %v1106_v15  ;;  %944 = vadd.xlane.f32.xlu0 %v832_v62  ;;  %946 = vadd.xlane.f32.xlu1 %v833_v18  ;;  %v2586_v21 = vmul.f32 0.125, %v657_v38 }
 0x1b8   :  { %v917_v0 = vpop.xlane.xlu0 %916  ;;  %v855_v22 = vpop.xlane.xlu1 %854 }
 0x1b9   :  { %v1234_v17 = vmax.f32 %v1170_v7, 0.0  ;;  %v1074_v10 = vmul.f32 0.125, %v917_v0  ;;  %v1043_v6 = vmul.f32 0.125, %v855_v22  ;;  %v1104_v38 = vmul.f32 %v2586_v21, %v2586_v21 }
 0x1bb   :  { %v1362_v19 = vadd.f32 1e-06, %v1234_v17  ;;  %v1202_v63 = vsub.f32 %v1074_v10, %v1138_v16  ;;  %v1171_v59 = vsub.f32 %v1043_v6, %v1107_v39  ;;  %700 = vadd.xlane.f32.xlu0 %v2431_v24  ;;  %702 = vadd.xlane.f32.xlu1 %v2441_v28  ;;  %v2596_v16 = vmul.f32 0.125, %v721_v14 }
 0x1bc   :  { %v919_v18 = vpop.xlane.xlu1 %918  ;;  %v659_v15 = vpop.xlane.xlu0 %658 }
 0x1bd   :  { %2065 = vrsqrt.f32 %v1362_v19  ;;  %v1266_v62 = vmax.f32 %v1202_v63, 0.0  ;;  %v1235_v23 = vmax.f32 %v1171_v59, 0.0  ;;  %v1075_v7 = vmul.f32 0.125, %v919_v18 }
 0x1be   :  { %v2591_v0 = vmul.f32 0.125, %v659_v15  ;;  %v1136_v14 = vmul.f32 %v2596_v16, %v2596_v16 }
 0x1bf   :  { %v1394_v22 = vadd.f32 1e-06, %v1266_v62  ;;  %v1363_v10 = vadd.f32 1e-06, %v1235_v23  ;;  %v1203_v6 = vsub.f32 %v1075_v7, %v1139_v8  ;;  %764 = vadd.xlane.f32.xlu0 %v2433_v25  ;;  %766 = vadd.xlane.f32.xlu1 %v2443_v29  ;;  %v2601_v23 = vmul.f32 0.125, %v723_v20 }
 0x1c0   :  { %v1105_v39 = vmul.f32 %v2591_v0, %v2591_v0  ;;  %v849_v63 = vpop.xlane.xlu0 %848  ;;  %v851_v59 = vpop.xlane.xlu1 %850  ;;  %v1298_v20 = vsub.f32 %v2323_v40, %v2563_v11 }
 0x1c1   :  { %2067 = vrsqrt.f32 %v1394_v22  ;;  %v1267_v19 = vmax.f32 %v1203_v6, 0.0  ;;  %v1040_v17 = vmul.f32 0.125, %v849_v63  ;;  %v1041_v18 = vmul.f32 0.125, %v851_v59  ;;  %v2614_v59 = vld [vmem:[%s3216_s2] ss:$0 sm:$0xff] }
 0x1c2   :  { %2069 = vrsqrt.f32 %v1363_v10  ;;  %v1137_v10 = vmul.f32 %v2601_v23, %v2601_v23 }
 0x1c3   :  { %v1395_v8 = vadd.f32 1e-06, %v1267_v19  ;;  %v1168_v15 = vsub.f32 %v1040_v17, %v1104_v38  ;;  %v1169_v62 = vsub.f32 %v1041_v18, %v1105_v39  ;;  %696 = vadd.xlane.f32.xlu0 %v2437_v26  ;;  %698 = vadd.xlane.f32.xlu1 %v2445_v30 }
 0x1c4   :  { %v913_v7 = vpop.xlane.xlu0 %912  ;;  %v915_v3 = vpop.xlane.xlu1 %914 }
 0x1c5   :  { %2071 = vrsqrt.f32 %v1395_v8  ;;  %v1232_v22 = vmax.f32 %v1168_v15, 0.0  ;;  %v1233_v6 = vmax.f32 %v1169_v62, 0.0  ;;  %v1072_v63 = vmul.f32 0.125, %v913_v7 }
 0x1c6   :  { %v1073_v38 = vmul.f32 0.125, %v915_v3  ;;  %v2621_v3 = vld [vmem:[%s3217_s3] ss:$0 sm:$0xff]  ;;  %v806_v7 = vmul.f32 %v2431_v24, %v2431_v24 }
 0x1c7   :  { %v2066_v39 = vpop.eup %2065  ;;  %v1360_v19 = vadd.f32 1e-06, %v1232_v22  ;;  %v1361_v17 = vadd.f32 1e-06, %v1233_v6  ;;  %v1200_v18 = vsub.f32 %v1072_v63, %v1136_v14  ;;  %760 = vadd.xlane.f32.xlu0 %v2439_v27  ;;  %762 = vadd.xlane.f32.xlu1 %v2447_v31  ;;  %v807_v14 = vmul.f32 %v2441_v28, %v2441_v28 }
 0x1c8   :  { %v1490_v8 = vmul.f32 %v2066_v39, %v1298_v20  ;;  %v1201_v15 = vsub.f32 %v1073_v38, %v1137_v10  ;;  %v669_v40 = vpop.xlane.xlu0 %668  ;;  %v671_v11 = vpop.xlane.xlu1 %670  ;;  %v1330_v22 = vsub.f32 %v2325_v41, %v2569_v2  ;;  %v1299_v10 = vsub.f32 %v2333_v44, %v2573_v9 }
 0x1c9   :  { %2073 = vrsqrt.f32 %v1360_v19  ;;  %v1264_v62 = vmax.f32 %v1200_v18, 0.0  ;;  %v838_v2 = vmul.f32 %v2433_v25, %v2433_v25  ;;  %v1331_v44 = vsub.f32 %v2335_v45, %v2581_v60 }
 0x1ca   :  { %v1561_v6 = vmul.f32 %v2614_v59, %v1490_v8  ;;  %2075 = vrsqrt.f32 %v1361_v17  ;;  %v1265_v63 = vmax.f32 %v1201_v15, 0.0  ;;  %v839_v17 = vmul.f32 %v2443_v29, %v2443_v29 }
 0x1cb   :  { %v2068_v20 = vpop.eup %2067  ;;  %v1392_v38 = vadd.f32 1e-06, %v1264_v62  ;;  %892 = vadd.xlane.f32.xlu0 %v806_v7  ;;  %894 = vadd.xlane.f32.xlu1 %v807_v14  ;;  %v804_v45 = vmul.f32 %v2437_v26, %v2437_v26  ;;  %v1296_v60 = vsub.f32 %v2331_v43, %v2586_v21  ;;  %v2657_v43 = vmul.f32 0.125, %v671_v11 }
 0x1cc   :  { %v2070_v39 = vpop.eup %2069  ;;  %v1632_v19 = vadd.f32 %v2621_v3, %v1561_v6  ;;  %v1522_v18 = vmul.f32 %v2068_v20, %v1330_v22  ;;  %v1393_v24 = vadd.f32 1e-06, %v1265_v63  ;;  %v733_v28 = vpop.xlane.xlu0 %732 }
 0x1cd   :  { %v2633_v36 = vpop.xlane.xlu1 %734  ;;  %v1491_v41 = vmul.f32 %v2070_v39, %v1299_v10  ;;  %2077 = vrsqrt.f32 %v1392_v38  ;;  %v805_v10 = vmul.f32 %v2445_v30, %v2445_v30 }
 0x1ce   :  { %v1696_v9 = vmax.f32 %v1632_v19, 0.0  ;;  %v1593_v8 = vmul.f32 %v2614_v59, %v1522_v18  ;;  %2079 = vrsqrt.f32 %v1393_v24  ;;  %v1297_v19 = vsub.f32 %v2337_v46, %v2591_v0 }
 0x1cf   :  { %v2072_v15 = vpop.eup %2071  ;;  %v1562_v62 = vmul.f32 %v2614_v59, %v1491_v41  ;;  %956 = vadd.xlane.f32.xlu0 %v838_v2  ;;  %958 = vadd.xlane.f32.xlu1 %v839_v17  ;;  %v2654_v18 = vmul.f32 0.125, %v669_v40  ;;  %v1328_v46 = vsub.f32 %v2328_v42, %v2596_v16 }
 0x1d0   :  { %1760 = vst [vmem:[#allocation7 + $0x10] sm:$0xff] %v1696_v9  ;;  %v1664_v7 = vadd.f32 %v2621_v3, %v1593_v8  ;;  %v1523_v14 = vmul.f32 %v2072_v15, %v1331_v44  ;;  %v665_v22 = vpop.xlane.xlu0 %664  ;;  %v836_v8 = vmul.f32 %v2439_v27, %v2439_v27  ;;  %v837_v15 = vmul.f32 %v2447_v31, %v2447_v31 }
 0x1d1   :  { %v667_v6 = vpop.xlane.xlu1 %666  ;;  %v1633_v63 = vadd.f32 %v2621_v3, %v1562_v62  ;;  %v1329_v62 = vsub.f32 %v2339_v47, %v2601_v23 }
 0x1d2   :  { %v1728_v24 = vmax.f32 %v1664_v7, 0.0  ;;  %v1594_v20 = vmul.f32 %v2614_v59, %v1523_v14  ;;  %v1110_v14 = vmul.f32 %v2654_v18, %v2654_v18 }
 0x1d3   :  { %v2074_v38 = vpop.eup %2073  ;;  %v1697_v39 = vmax.f32 %v1633_v63, 0.0  ;;  %888 = vadd.xlane.f32.xlu0 %v804_v45  ;;  %890 = vadd.xlane.f32.xlu1 %v805_v10  ;;  %v1111_v45 = vmul.f32 %v2657_v43, %v2657_v43 }
 0x1d4   :  { %v2076_v41 = vpop.eup %2075  ;;  %1792 = vst [vmem:[#allocation7 + $0x110] sm:$0xff] %v1728_v24  ;;  %v1665_v2 = vadd.f32 %v2621_v3, %v1594_v20  ;;  %v1488_v17 = vmul.f32 %v2074_v38, %v1296_v60  ;;  %v729_v21 = vpop.xlane.xlu0 %728  ;;  %v2676_v60 = vmul.f32 0.125, %v733_v28 }
 0x1d5   :  { %v2659_v44 = vpop.xlane.xlu1 %730  ;;  %1761 = vst [vmem:[#allocation7 + $0x18] sm:$0xff] %v1697_v39  ;;  %v1489_v9 = vmul.f32 %v2076_v41, %v1297_v19  ;;  %v2681_v41 = vmul.f32 0.125, %v2633_v36 }
 0x1d6   :  { %v1729_v0 = vmax.f32 %v1665_v2, 0.0  ;;  %v1559_v40 = vmul.f32 %v2614_v59, %v1488_v17 }
 0x1d7   :  { %v2078_v11 = vpop.eup %2077  ;;  %v1560_v7 = vmul.f32 %v2614_v59, %v1489_v9  ;;  %952 = vadd.xlane.f32.xlu0 %v836_v8  ;;  %954 = vadd.xlane.f32.xlu1 %v837_v15 }
 0x1d8   :  { %v2080_v63 = vpop.eup %2079  ;;  %1793 = vst [vmem:[#allocation7 + $0x118] sm:$0xff] %v1729_v0  ;;  %v1630_v42 = vadd.f32 %v2621_v3, %v1559_v40  ;;  %v1520_v16 = vmul.f32 %v2078_v11, %v1328_v46  ;;  %v861_v24 = vpop.xlane.xlu0 %860  ;;  %v1142_v46 = vmul.f32 %v2676_v60, %v2676_v60  ;;  %v2688_v0 = vmul.f32 0.125, %v665_v22 }
 0x1d9   :  { %v863_v20 = vpop.xlane.xlu1 %862  ;;  %v1631_v47 = vadd.f32 %v2621_v3, %v1560_v7  ;;  %v1521_v23 = vmul.f32 %v2080_v63, %v1329_v62  ;;  %v1046_v10 = vmul.f32 0.125, %v861_v24  ;;  %v2690_v40 = vmul.f32 0.125, %v667_v6 }
 0x1da   :  { %v1047_v38 = vmul.f32 0.125, %v863_v20  ;;  %v1694_v39 = vmax.f32 %v1630_v42, 0.0  ;;  %v1591_v19 = vmul.f32 %v2614_v59, %v1520_v16  ;;  %v1143_v42 = vmul.f32 %v2681_v41, %v2681_v41 }
 0x1db   :  { %v1695_v2 = vmax.f32 %v1631_v47, 0.0  ;;  %v1592_v17 = vmul.f32 %v2614_v59, %v1521_v23  ;;  %v1174_v9 = vsub.f32 %v1046_v10, %v1110_v14  ;;  %708 = vadd.xlane.f32.xlu0 %v2467_v54  ;;  %710 = vadd.xlane.f32.xlu1 %v2471_v58  ;;  %v1108_v20 = vmul.f32 %v2688_v0, %v2688_v0 }
 0x1dc   :  { %v1175_v28 = vsub.f32 %v1047_v38, %v1111_v45  ;;  %1758 = vst [vmem:[#allocation7] sm:$0xff] %v1694_v39  ;;  %v1662_v8 = vadd.f32 %v2621_v3, %v1591_v19  ;;  %v925_v36 = vpop.xlane.xlu0 %924  ;;  %v1109_v47 = vmul.f32 %v2690_v40, %v2690_v40  ;;  %v2701_v23 = vmul.f32 0.125, %v729_v21 }
 0x1dd   :  { %v927_v15 = vpop.xlane.xlu1 %926  ;;  %1759 = vst [vmem:[#allocation7 + $0x8] sm:$0xff] %v1695_v2  ;;  %v1663_v11 = vadd.f32 %v2621_v3, %v1592_v17  ;;  %v1238_v62 = vmax.f32 %v1174_v9, 0.0  ;;  %v1078_v14 = vmul.f32 0.125, %v925_v36  ;;  %v2705_v9 = vmul.f32 0.125, %v2659_v44 }
 0x1de   :  { %v1239_v7 = vmax.f32 %v1175_v28, 0.0  ;;  %v1726_v63 = vmax.f32 %v1662_v8, 0.0  ;;  %v1079_v16 = vmul.f32 0.125, %v927_v15  ;;  %v1140_v21 = vmul.f32 %v2701_v23, %v2701_v23 }
 0x1df   :  { %v1727_v45 = vmax.f32 %v1663_v11, 0.0  ;;  %v1366_v22 = vadd.f32 1e-06, %v1238_v62  ;;  %v1206_v6 = vsub.f32 %v1078_v14, %v1142_v46  ;;  %772 = vadd.xlane.f32.xlu0 %v2475_v4  ;;  %774 = vadd.xlane.f32.xlu1 %v2481_v12 }
 0x1e0   :  { %v1367_v24 = vadd.f32 1e-06, %v1239_v7  ;;  %1790 = vst [vmem:[#allocation7 + $0x100] sm:$0xff] %v1726_v63  ;;  %v1207_v10 = vsub.f32 %v1079_v16, %v1143_v42  ;;  %v857_v38 = vpop.xlane.xlu0 %856  ;;  %v1141_v63 = vmul.f32 %v2705_v9, %v2705_v9 }
 0x1e1   :  { %v859_v39 = vpop.xlane.xlu1 %858  ;;  %1791 = vst [vmem:[#allocation7 + $0x108] sm:$0xff] %v1727_v45  ;;  %2081 = vrsqrt.f32 %v1366_v22  ;;  %v1270_v19 = vmax.f32 %v1206_v6, 0.0  ;;  %v1044_v2 = vmul.f32 0.125, %v857_v38  ;;  %v1302_v38 = vsub.f32 %v2343_v48, %v2654_v18 }
 0x1e2   :  { %v1045_v17 = vmul.f32 0.125, %v859_v39  ;;  %2083 = vrsqrt.f32 %v1367_v24  ;;  %v1271_v28 = vmax.f32 %v1207_v10, 0.0  ;;  %v811_v39 = vmul.f32 %v2471_v58, %v2471_v58 }
 0x1e3   :  { %v1398_v8 = vadd.f32 1e-06, %v1270_v19  ;;  %v1172_v46 = vsub.f32 %v1044_v2, %v1108_v20  ;;  %704 = vadd.xlane.f32.xlu0 %v2469_v57  ;;  %706 = vadd.xlane.f32.xlu1 %v2473_v1  ;;  %v842_v48 = vmul.f32 %v2475_v4, %v2475_v4  ;;  %v1334_v18 = vsub.f32 %v2345_v49, %v2676_v60 }
 0x1e4   :  { %v1173_v36 = vsub.f32 %v1045_v17, %v1109_v47  ;;  %v1399_v15 = vadd.f32 1e-06, %v1271_v28  ;;  %v921_v11 = vpop.xlane.xlu0 %920  ;;  %v810_v47 = vmul.f32 %v2467_v54, %v2467_v54  ;;  %v1303_v17 = vsub.f32 %v2353_v52, %v2657_v43 }
 0x1e5   :  { %v923_v62 = vpop.xlane.xlu1 %922  ;;  %2085 = vrsqrt.f32 %v1398_v8  ;;  %v1236_v7 = vmax.f32 %v1172_v46, 0.0  ;;  %v1076_v44 = vmul.f32 0.125, %v921_v11  ;;  %v843_v52 = vmul.f32 %v2481_v12, %v2481_v12 }
 0x1e6   :  { %v1237_v14 = vmax.f32 %v1173_v36, 0.0  ;;  %2087 = vrsqrt.f32 %v1399_v15  ;;  %v1077_v42 = vmul.f32 0.125, %v923_v62  ;;  %v808_v60 = vmul.f32 %v2469_v57, %v2469_v57 }
 0x1e7   :  { %v1364_v16 = vadd.f32 1e-06, %v1236_v7  ;;  %v1204_v22 = vsub.f32 %v1076_v44, %v1140_v21  ;;  %768 = vadd.xlane.f32.xlu0 %v2479_v5  ;;  %770 = vadd.xlane.f32.xlu1 %v2483_v13  ;;  %v1335_v7 = vsub.f32 %v2355_v53, %v2681_v41  ;;  %v809_v41 = vmul.f32 %v2473_v1, %v2473_v1 }
 0x1e8   :  { %v1365_v45 = vadd.f32 1e-06, %v1237_v14  ;;  %v1205_v24 = vsub.f32 %v1077_v42, %v1141_v63  ;;  %v677_v6 = vpop.xlane.xlu0 %676 }
 0x1e9   :  { %v679_v20 = vpop.xlane.xlu1 %678  ;;  %2089 = vrsqrt.f32 %v1364_v16  ;;  %v1268_v10 = vmax.f32 %v1204_v22, 0.0 }
 0x1ea   :  { %2091 = vrsqrt.f32 %v1365_v45  ;;  %v1269_v19 = vmax.f32 %v1205_v24, 0.0  ;;  %v1300_v24 = vsub.f32 %v2349_v50, %v2688_v0 }
 0x1eb   :  { %v2082_v2 = vpop.eup %2081  ;;  %v1396_v28 = vadd.f32 1e-06, %v1268_v10  ;;  %900 = vadd.xlane.f32.xlu0 %v810_v47  ;;  %902 = vadd.xlane.f32.xlu1 %v811_v39 }
 0x1ec   :  { %v2084_v8 = vpop.eup %2083  ;;  %v1494_v46 = vmul.f32 %v2082_v2, %v1302_v38  ;;  %v1397_v36 = vadd.f32 1e-06, %v1269_v19  ;;  %v741_v21 = vpop.xlane.xlu0 %740  ;;  %v1301_v38 = vsub.f32 %v2359_v55, %v2690_v40  ;;  %v2747_v2 = vmul.f32 0.125, %v677_v6 }
 0x1ed   :  { %v2723_v15 = vpop.xlane.xlu1 %742  ;;  %v1495_v11 = vmul.f32 %v2084_v8, %v1303_v17  ;;  %2093 = vrsqrt.f32 %v1396_v28  ;;  %v2750_v28 = vmul.f32 0.125, %v679_v20  ;;  %v840_v55 = vmul.f32 %v2479_v5, %v2479_v5 }
 0x1ee   :  { %v1565_v62 = vmul.f32 %v2614_v59, %v1494_v46  ;;  %2095 = vrsqrt.f32 %v1397_v36  ;;  %v1332_v36 = vsub.f32 %v2351_v51, %v2701_v23 }
 0x1ef   :  { %v2086_v43 = vpop.eup %2085  ;;  %v1566_v14 = vmul.f32 %v2614_v59, %v1495_v11  ;;  %964 = vadd.xlane.f32.xlu0 %v842_v48  ;;  %966 = vadd.xlane.f32.xlu1 %v843_v52  ;;  %v841_v11 = vmul.f32 %v2483_v13, %v2483_v13 }
 0x1f0   :  { %v2088_v44 = vpop.eup %2087  ;;  %v1636_v63 = vadd.f32 %v2621_v3, %v1565_v62  ;;  %v1526_v42 = vmul.f32 %v2086_v43, %v1334_v18  ;;  %v673_v16 = vpop.xlane.xlu0 %672  ;;  %v1333_v62 = vsub.f32 %v2361_v56, %v2705_v9 }
 0x1f1   :  { %v675_v49 = vpop.xlane.xlu1 %674  ;;  %v1637_v45 = vadd.f32 %v2621_v3, %v1566_v14  ;;  %v1527_v22 = vmul.f32 %v2088_v44, %v1335_v7  ;;  %v1114_v7 = vmul.f32 %v2747_v2, %v2747_v2  ;;  %v1115_v44 = vmul.f32 %v2750_v28, %v2750_v28 }
 0x1f2   :  { %v1700_v53 = vmax.f32 %v1636_v63, 0.0  ;;  %v1597_v47 = vmul.f32 %v2614_v59, %v1526_v42  ;;  %v2770_v63 = vmul.f32 0.125, %v741_v21 }
 0x1f3   :  { %v2090_v10 = vpop.eup %2089  ;;  %v1701_v39 = vmax.f32 %v1637_v45, 0.0  ;;  %v1598_v19 = vmul.f32 %v2614_v59, %v1527_v22  ;;  %896 = vadd.xlane.f32.xlu0 %v808_v60  ;;  %898 = vadd.xlane.f32.xlu1 %v809_v41  ;;  %v2775_v41 = vmul.f32 0.125, %v2723_v15 }
 0x1f4   :  { %v2092_v17 = vpop.eup %2091  ;;  %1764 = vst [vmem:[#allocation7 + $0x30] sm:$0xff] %v1700_v53  ;;  %v1668_v50 = vadd.f32 %v2621_v3, %v1597_v47  ;;  %v1492_v0 = vmul.f32 %v2090_v10, %v1300_v24  ;;  %v737_v8 = vpop.xlane.xlu0 %736 }
 0x1f5   :  { %v2752_v46 = vpop.xlane.xlu1 %738  ;;  %1765 = vst [vmem:[#allocation7 + $0x38] sm:$0xff] %v1701_v39  ;;  %v1669_v40 = vadd.f32 %v2621_v3, %v1598_v19  ;;  %v1493_v6 = vmul.f32 %v2092_v17, %v1301_v38  ;;  %v1146_v19 = vmul.f32 %v2770_v63, %v2770_v63  ;;  %v2782_v17 = vmul.f32 0.125, %v673_v16 }
 0x1f6   :  { %v1732_v48 = vmax.f32 %v1668_v50, 0.0  ;;  %v1563_v20 = vmul.f32 %v2614_v59, %v1492_v0  ;;  %v2784_v50 = vmul.f32 0.125, %v675_v49 }
 0x1f7   :  { %v2094_v18 = vpop.eup %2093  ;;  %v1733_v52 = vmax.f32 %v1669_v40, 0.0  ;;  %v1564_v43 = vmul.f32 %v2614_v59, %v1493_v6  ;;  %960 = vadd.xlane.f32.xlu0 %v840_v55  ;;  %962 = vadd.xlane.f32.xlu1 %v841_v11 }
 0x1f8   :  { %v2096_v14 = vpop.eup %2095  ;;  %1796 = vst [vmem:[#allocation7 + $0x130] sm:$0xff] %v1732_v48  ;;  %v1634_v51 = vadd.f32 %v2621_v3, %v1563_v20  ;;  %v1524_v23 = vmul.f32 %v2094_v18, %v1332_v36  ;;  %v869_v42 = vpop.xlane.xlu0 %868  ;;  %v1147_v48 = vmul.f32 %v2775_v41, %v2775_v41 }
 0x1f9   :  { %v871_v56 = vpop.xlane.xlu1 %870  ;;  %1797 = vst [vmem:[#allocation7 + $0x138] sm:$0xff] %v1733_v52  ;;  %v1635_v9 = vadd.f32 %v2621_v3, %v1564_v43  ;;  %v1525_v60 = vmul.f32 %v2096_v14, %v1333_v62  ;;  %v1050_v45 = vmul.f32 0.125, %v869_v42  ;;  %v1112_v52 = vmul.f32 %v2782_v17, %v2782_v17 }
 0x1fa   :  { %v1051_v22 = vmul.f32 0.125, %v871_v56  ;;  %v1698_v24 = vmax.f32 %v1634_v51, 0.0  ;;  %v1595_v53 = vmul.f32 %v2614_v59, %v1524_v23  ;;  %v1113_v43 = vmul.f32 %v2784_v50, %v2784_v50 }
 0x1fb   :  { %v1699_v47 = vmax.f32 %v1635_v9, 0.0  ;;  %v1596_v10 = vmul.f32 %v2614_v59, %v1525_v60  ;;  %v1178_v21 = vsub.f32 %v1050_v45, %v1114_v7  ;;  %716 = vadd.xlane.f32.xlu0 %v2507_v32  ;;  %718 = vadd.xlane.f32.xlu1 %v2511_v34  ;;  %v2795_v7 = vmul.f32 0.125, %v737_v8 }
 0x1fc   :  { %v1179_v38 = vsub.f32 %v1051_v22, %v1115_v44  ;;  %1762 = vst [vmem:[#allocation7 + $0x20] sm:$0xff] %v1698_v24  ;;  %v1666_v39 = vadd.f32 %v2621_v3, %v1595_v53  ;;  %v933_v15 = vpop.xlane.xlu0 %932  ;;  %v2799_v9 = vmul.f32 0.125, %v2752_v46 }
 0x1fd   :  { %v935_v0 = vpop.xlane.xlu1 %934  ;;  %1763 = vst [vmem:[#allocation7 + $0x28] sm:$0xff] %v1699_v47  ;;  %v1667_v55 = vadd.f32 %v2621_v3, %v1596_v10  ;;  %v1242_v40 = vmax.f32 %v1178_v21, 0.0  ;;  %v1082_v36 = vmul.f32 0.125, %v933_v15  ;;  %v1144_v8 = vmul.f32 %v2795_v7, %v2795_v7 }
 0x1fe   :  { %v1243_v6 = vmax.f32 %v1179_v38, 0.0  ;;  %v1730_v11 = vmax.f32 %v1666_v39, 0.0  ;;  %v1083_v20 = vmul.f32 0.125, %v935_v0  ;;  %v1145_v39 = vmul.f32 %v2799_v9, %v2799_v9 }
 0x1ff   :  { %v1731_v18 = vmax.f32 %v1667_v55, 0.0  ;;  %v1370_v16 = vadd.f32 1e-06, %v1242_v40  ;;  %v1210_v49 = vsub.f32 %v1082_v36, %v1146_v19  ;;  %780 = vadd.xlane.f32.xlu0 %v2515_v61  ;;  %782 = vadd.xlane.f32.xlu1 %v2521_v37  ;;  %v3275_v40 = vld [vmem:[#allocation37_spill] sm:$0xff]  ;;  %v3276_v36 = vld [vmem:[#allocation38_spill] sm:$0xff] }
 0x200   :  { %v1371_v62 = vadd.f32 1e-06, %v1243_v6  ;;  %1794 = vst [vmem:[#allocation7 + $0x120] sm:$0xff] %v1730_v11  ;;  %v1211_v14 = vsub.f32 %v1083_v20, %v1147_v48  ;;  %v865_v51 = vpop.xlane.xlu0 %864  ;;  %v814_v20 = vmul.f32 %v2507_v32, %v2507_v32 }
 0x201   :  { %v867_v23 = vpop.xlane.xlu1 %866  ;;  %1795 = vst [vmem:[#allocation7 + $0x128] sm:$0xff] %v1731_v18  ;;  %2097 = vrsqrt.f32 %v1370_v16  ;;  %v1274_v44 = vmax.f32 %v1210_v49, 0.0  ;;  %v1048_v42 = vmul.f32 0.125, %v865_v51  ;;  %v3277_v16 = vld [vmem:[#allocation11_spill] sm:$0xff]  ;;  %v815_v49 = vmul.f32 %v2511_v34, %v2511_v34 }
 0x202   :  { %v1049_v56 = vmul.f32 0.125, %v867_v23  ;;  %2099 = vrsqrt.f32 %v1371_v62  ;;  %v1275_v60 = vmax.f32 %v1211_v14, 0.0  ;;  %v1306_v62 = vsub.f32 %v3277_v16, %v2747_v2  ;;  %v3278_v14 = vld [vmem:[#allocation15_spill] sm:$0xff] }
 0x203   :  { %v1402_v45 = vadd.f32 1e-06, %v1274_v44  ;;  %v1176_v22 = vsub.f32 %v1048_v42, %v1112_v52  ;;  %712 = vadd.xlane.f32.xlu0 %v2509_v33  ;;  %714 = vadd.xlane.f32.xlu1 %v2513_v35  ;;  %v1307_v51 = vsub.f32 %v3278_v14, %v2750_v28  ;;  %v812_v2 = vmul.f32 %v2509_v33, %v2509_v33 }
 0x204   :  { %v1177_v24 = vsub.f32 %v1049_v56, %v1113_v43  ;;  %v1403_v53 = vadd.f32 1e-06, %v1275_v60  ;;  %v929_v47 = vpop.xlane.xlu0 %928  ;;  %v813_v28 = vmul.f32 %v2513_v35, %v2513_v35  ;;  %v845_v16 = vmul.f32 %v3276_v36, %v3276_v36 }
 0x205   :  { %v931_v10 = vpop.xlane.xlu1 %930  ;;  %2101 = vrsqrt.f32 %v1402_v45  ;;  %v1240_v21 = vmax.f32 %v1176_v22, 0.0  ;;  %v1080_v46 = vmul.f32 0.125, %v929_v47 }
 0x206   :  { %v1241_v38 = vmax.f32 %v1177_v24, 0.0  ;;  %2103 = vrsqrt.f32 %v1403_v53  ;;  %v1081_v19 = vmul.f32 0.125, %v931_v10  ;;  %v3279_v24 = vld [vmem:[#allocation12_spill] sm:$0xff] }
 0x207   :  { %v1368_v15 = vadd.f32 1e-06, %v1240_v21  ;;  %v1208_v55 = vsub.f32 %v1080_v46, %v1144_v8  ;;  %776 = vadd.xlane.f32.xlu0 %v3275_v40  ;;  %778 = vadd.xlane.f32.xlu1 %v3276_v36  ;;  %v1338_v8 = vsub.f32 %v3279_v24, %v2770_v63  ;;  %v3280_v10 = vld [vmem:[#allocation16_spill] sm:$0xff] }
 0x208   :  { %v1369_v0 = vadd.f32 1e-06, %v1241_v38  ;;  %v1209_v6 = vsub.f32 %v1081_v19, %v1145_v39  ;;  %v685_v11 = vpop.xlane.xlu0 %684  ;;  %v1339_v21 = vsub.f32 %v3280_v10, %v2775_v41 }
 0x209   :  { %v687_v48 = vpop.xlane.xlu1 %686  ;;  %2105 = vrsqrt.f32 %v1368_v15  ;;  %v1272_v18 = vmax.f32 %v1208_v55, 0.0  ;;  %v844_v55 = vmul.f32 %v3275_v40, %v3275_v40 }
 0x20a   :  { %2107 = vrsqrt.f32 %v1369_v0  ;;  %v1273_v52 = vmax.f32 %v1209_v6, 0.0 }
 0x20b   :  { %v2098_v43 = vpop.eup %2097  ;;  %v1400_v23 = vadd.f32 1e-06, %v1272_v18  ;;  %908 = vadd.xlane.f32.xlu0 %v814_v20  ;;  %910 = vadd.xlane.f32.xlu1 %v815_v49  ;;  %v3281_v20 = vld [vmem:[#allocation13_spill] sm:$0xff] }
 0x20c   :  { %v2100_v44 = vpop.eup %2099  ;;  %v1498_v42 = vmul.f32 %v2098_v43, %v1306_v62  ;;  %v1401_v56 = vadd.f32 1e-06, %v1273_v52  ;;  %v749_v60 = vpop.xlane.xlu0 %748  ;;  %v1304_v18 = vsub.f32 %v3281_v20, %v2782_v17  ;;  %v3282_v52 = vld [vmem:[#allocation17_spill] sm:$0xff] }
 0x20d   :  { %v2817_v45 = vpop.xlane.xlu1 %750  ;;  %v1499_v22 = vmul.f32 %v2100_v44, %v1307_v51  ;;  %2109 = vrsqrt.f32 %v1400_v23  ;;  %v1305_v43 = vsub.f32 %v3282_v52, %v2784_v50  ;;  %v2841_v23 = vmul.f32 0.125, %v685_v11 }
 0x20e   :  { %v1569_v53 = vmul.f32 %v2614_v59, %v1498_v42  ;;  %2111 = vrsqrt.f32 %v1401_v56  ;;  %v2844_v56 = vmul.f32 0.125, %v687_v48  ;;  %v846_v50 = vmul.f32 %v2515_v61, %v2515_v61 }
 0x20f   :  { %v2102_v47 = vpop.eup %2101  ;;  %v1570_v38 = vmul.f32 %v2614_v59, %v1499_v22  ;;  %904 = vadd.xlane.f32.xlu0 %v812_v2  ;;  %906 = vadd.xlane.f32.xlu1 %v813_v28  ;;  %v847_v28 = vmul.f32 %v2521_v37, %v2521_v37  ;;  %v2864_v20 = vmul.f32 0.125, %v749_v60 }
 0x210   :  { %v2104_v46 = vpop.eup %2103  ;;  %v1640_v39 = vadd.f32 %v2621_v3, %v1569_v53  ;;  %v1530_v19 = vmul.f32 %v2102_v47, %v1338_v8  ;;  %v681_v15 = vpop.xlane.xlu0 %680  ;;  %v3283_v8 = vld [vmem:[#allocation14_spill] sm:$0xff] }
 0x211   :  { %v683_v63 = vpop.xlane.xlu1 %682  ;;  %v1641_v0 = vadd.f32 %v2621_v3, %v1570_v38  ;;  %v1531_v6 = vmul.f32 %v2104_v46, %v1339_v21  ;;  %v1336_v53 = vsub.f32 %v3283_v8, %v2795_v7  ;;  %v3284_v21 = vld [vmem:[#allocation18_spill] sm:$0xff] }
 0x212   :  { %v1704_v41 = vmax.f32 %v1640_v39, 0.0  ;;  %v1601_v62 = vmul.f32 %v2614_v59, %v1530_v19  ;;  %v1337_v38 = vsub.f32 %v3284_v21, %v2799_v9  ;;  %v1118_v19 = vmul.f32 %v2841_v23, %v2841_v23 }
 0x213   :  { %v2106_v49 = vpop.eup %2105  ;;  %v1705_v14 = vmax.f32 %v1641_v0, 0.0  ;;  %v1602_v51 = vmul.f32 %v2614_v59, %v1531_v6  ;;  %968 = vadd.xlane.f32.xlu0 %v844_v55  ;;  %970 = vadd.xlane.f32.xlu1 %v845_v16  ;;  %v1119_v6 = vmul.f32 %v2844_v56, %v2844_v56 }
 0x214   :  { %v2108_v44 = vpop.eup %2107  ;;  %1768 = vst [vmem:[#allocation7 + $0x50] sm:$0xff] %v1704_v41  ;;  %v1672_v17 = vadd.f32 %v2621_v3, %v1601_v62  ;;  %v1496_v42 = vmul.f32 %v2106_v49, %v1304_v18  ;;  %v745_v2 = vpop.xlane.xlu0 %744 }
 0x215   :  { %v2846_v22 = vpop.xlane.xlu1 %746  ;;  %1769 = vst [vmem:[#allocation7 + $0x58] sm:$0xff] %v1705_v14  ;;  %v1673_v24 = vadd.f32 %v2621_v3, %v1602_v51  ;;  %v1497_v11 = vmul.f32 %v2108_v44, %v1305_v43  ;;  %v2869_v14 = vmul.f32 0.125, %v2817_v45 }
 0x216   :  { %v1736_v47 = vmax.f32 %v1672_v17, 0.0  ;;  %v1567_v48 = vmul.f32 %v2614_v59, %v1496_v42 }
 0x217   :  { %v2110_v10 = vpop.eup %2109  ;;  %v1737_v46 = vmax.f32 %v1673_v24, 0.0  ;;  %v1568_v39 = vmul.f32 %v2614_v59, %v1497_v11  ;;  %972 = vadd.xlane.f32.xlu0 %v846_v50  ;;  %974 = vadd.xlane.f32.xlu1 %v847_v28  ;;  %v1150_v50 = vmul.f32 %v2864_v20, %v2864_v20  ;;  %v2875_v24 = vmul.f32 0.125, %v681_v15 }
 0x218   :  { %v2112_v0 = vpop.eup %2111  ;;  %1800 = vst [vmem:[#allocation7 + $0x150] sm:$0xff] %v1736_v47  ;;  %v1638_v7 = vadd.f32 %v2621_v3, %v1567_v48  ;;  %v1528_v55 = vmul.f32 %v2110_v10, %v1336_v53  ;;  %v877_v18 = vpop.xlane.xlu0 %876  ;;  %v2877_v11 = vmul.f32 0.125, %v683_v63  ;;  %v1151_v21 = vmul.f32 %v2869_v14, %v2869_v14 }
 0x219   :  { %v879_v9 = vpop.xlane.xlu1 %878  ;;  %1801 = vst [vmem:[#allocation7 + $0x158] sm:$0xff] %v1737_v46  ;;  %v1639_v41 = vadd.f32 %v2621_v3, %v1568_v39  ;;  %v1529_v16 = vmul.f32 %v2112_v0, %v1337_v38  ;;  %v1054_v62 = vmul.f32 0.125, %v877_v18  ;;  %v1116_v63 = vmul.f32 %v2875_v24, %v2875_v24 }
 0x21a   :  { %v1055_v49 = vmul.f32 0.125, %v879_v9  ;;  %v1702_v52 = vmax.f32 %v1638_v7, 0.0  ;;  %v1599_v43 = vmul.f32 %v2614_v59, %v1528_v55  ;;  %v1117_v0 = vmul.f32 %v2877_v11, %v2877_v11 }
 0x21b   :  { %v1703_v51 = vmax.f32 %v1639_v41, 0.0  ;;  %v1600_v44 = vmul.f32 %v2614_v59, %v1529_v16  ;;  %v1182_v60 = vsub.f32 %v1054_v62, %v1118_v19  ;;  %v2886_v7 = vmul.f32 0.125, %v745_v2 }
 0x21c   :  { %v1183_v17 = vsub.f32 %v1055_v49, %v1119_v6  ;;  %1766 = vst [vmem:[#allocation7 + $0x40] sm:$0xff] %v1702_v52  ;;  %v1670_v42 = vadd.f32 %v2621_v3, %v1599_v43  ;;  %v941_v8 = vpop.xlane.xlu0 %940  ;;  %v2889_v62 = vmul.f32 0.125, %v2846_v22 }
 0x21d   :  { %v943_v53 = vpop.xlane.xlu1 %942  ;;  %1767 = vst [vmem:[#allocation7 + $0x48] sm:$0xff] %v1703_v51  ;;  %v1671_v45 = vadd.f32 %v2621_v3, %v1600_v44  ;;  %v1246_v28 = vmax.f32 %v1182_v60, 0.0  ;;  %v1086_v48 = vmul.f32 0.125, %v941_v8  ;;  %v1148_v2 = vmul.f32 %v2886_v7, %v2886_v7 }
 0x21e   :  { %v1247_v47 = vmax.f32 %v1183_v17, 0.0  ;;  %v1734_v10 = vmax.f32 %v1670_v42, 0.0  ;;  %v1087_v38 = vmul.f32 0.125, %v943_v53  ;;  %v1149_v53 = vmul.f32 %v2889_v62, %v2889_v62 }
 0x21f   :  { %v1735_v46 = vmax.f32 %v1671_v45, 0.0  ;;  %v1374_v39 = vadd.f32 1e-06, %v1246_v28  ;;  %v1214_v15 = vsub.f32 %v1086_v48, %v1150_v50 }
 0x220   :  { %v1375_v19 = vadd.f32 1e-06, %v1247_v47  ;;  %1798 = vst [vmem:[#allocation7 + $0x140] sm:$0xff] %v1734_v10  ;;  %v1215_v55 = vsub.f32 %v1087_v38, %v1151_v21  ;;  %v873_v6 = vpop.xlane.xlu0 %872 }
 0x221   :  { %v875_v18 = vpop.xlane.xlu1 %874  ;;  %1799 = vst [vmem:[#allocation7 + $0x148] sm:$0xff] %v1735_v46  ;;  %2113 = vrsqrt.f32 %v1374_v39  ;;  %v1278_v9 = vmax.f32 %v1214_v15, 0.0  ;;  %v1052_v41 = vmul.f32 0.125, %v873_v6  ;;  %v3285_v46 = vld [vmem:[#allocation19_spill] sm:$0xff] }
 0x222   :  { %v1053_v16 = vmul.f32 0.125, %v875_v18  ;;  %2115 = vrsqrt.f32 %v1375_v19  ;;  %v1279_v49 = vmax.f32 %v1215_v55, 0.0  ;;  %v1310_v39 = vsub.f32 %v3285_v46, %v2841_v23 }
 0x223   :  { %v1406_v52 = vadd.f32 1e-06, %v1278_v9  ;;  %v1180_v43 = vsub.f32 %v1052_v41, %v1116_v63  ;;  %v3286_v63 = vld [vmem:[#allocation23_spill] sm:$0xff] }
 0x224   :  { %v1181_v51 = vsub.f32 %v1053_v16, %v1117_v0  ;;  %v1407_v44 = vadd.f32 1e-06, %v1279_v49  ;;  %v937_v60 = vpop.xlane.xlu0 %936  ;;  %v1311_v0 = vsub.f32 %v3286_v63, %v2844_v56 }
 0x225   :  { %v939_v17 = vpop.xlane.xlu1 %938  ;;  %2117 = vrsqrt.f32 %v1406_v52  ;;  %v1244_v42 = vmax.f32 %v1180_v43, 0.0  ;;  %v1084_v8 = vmul.f32 0.125, %v937_v60  ;;  %v3287_v52 = vld [vmem:[#allocation20_spill] sm:$0xff] }
 0x226   :  { %v1245_v50 = vmax.f32 %v1181_v51, 0.0  ;;  %2119 = vrsqrt.f32 %v1407_v44  ;;  %v1085_v22 = vmul.f32 0.125, %v939_v17  ;;  %v1342_v43 = vsub.f32 %v3287_v52, %v2864_v20  ;;  %v3289_v20 = vld [vmem:[#allocation21_spill] sm:$0xff] }
 0x227   :  { %v1372_v45 = vadd.f32 1e-06, %v1244_v42  ;;  %v1212_v47 = vsub.f32 %v1084_v8, %v1148_v2  ;;  %v3288_v2 = vld [vmem:[#allocation24_spill] sm:$0xff] }
 0x228   :  { %v1373_v28 = vadd.f32 1e-06, %v1245_v50  ;;  %v1213_v48 = vsub.f32 %v1085_v22, %v1149_v53  ;;  %v693_v10 = vpop.xlane.xlu0 %692  ;;  %v1343_v44 = vsub.f32 %v3288_v2, %v2869_v14  ;;  %v3290_v14 = vld [vmem:[#allocation25_spill] sm:$0xff] }
 0x229   :  { %v695_v21 = vpop.xlane.xlu1 %694  ;;  %2121 = vrsqrt.f32 %v1372_v45  ;;  %v1276_v38 = vmax.f32 %v1212_v47, 0.0  ;;  %v1308_v45 = vsub.f32 %v3289_v20, %v2875_v24 }
 0x22a   :  { %2123 = vrsqrt.f32 %v1373_v28  ;;  %v1277_v19 = vmax.f32 %v1213_v48, 0.0 }
 0x22b   :  { %v2114_v15 = vpop.eup %2113  ;;  %v1404_v55 = vadd.f32 1e-06, %v1276_v38  ;;  %v1309_v38 = vsub.f32 %v3290_v14, %v2877_v11  ;;  %v3291_v11 = vld [vmem:[#allocation22_spill] sm:$0xff] }
 0x22c   :  { %v2116_v6 = vpop.eup %2115  ;;  %v1502_v18 = vmul.f32 %v2114_v15, %v1310_v39  ;;  %v1405_v9 = vadd.f32 1e-06, %v1277_v19  ;;  %v757_v41 = vpop.xlane.xlu0 %756 }
 0x22d   :  { %v759_v16 = vpop.xlane.xlu1 %758  ;;  %v1503_v49 = vmul.f32 %v2116_v6, %v1311_v0  ;;  %2125 = vrsqrt.f32 %v1404_v55  ;;  %v2914_v0 = vmul.f32 0.125, %v693_v10  ;;  %v2916_v55 = vmul.f32 0.125, %v695_v21 }
 0x22e   :  { %v1573_v51 = vmul.f32 %v2614_v59, %v1502_v18  ;;  %2127 = vrsqrt.f32 %v1405_v9 }
 0x22f   :  { %v2118_v23 = vpop.eup %2117  ;;  %v1574_v56 = vmul.f32 %v2614_v59, %v1503_v49  ;;  %v1340_v49 = vsub.f32 %v3291_v11, %v2886_v7  ;;  %v1123_v7 = vmul.f32 %v2916_v55, %v2916_v55 }
 0x230   :  { %v2120_v60 = vpop.eup %2119  ;;  %v1644_v17 = vadd.f32 %v2621_v3, %v1573_v51  ;;  %v1534_v42 = vmul.f32 %v2118_v23, %v1342_v43  ;;  %v689_v50 = vpop.xlane.xlu0 %688  ;;  %v3292_v23 = vld [vmem:[#allocation26_spill] sm:$0xff] }
 0x231   :  { %v691_v8 = vpop.xlane.xlu1 %690  ;;  %v1645_v53 = vadd.f32 %v2621_v3, %v1574_v56  ;;  %v1535_v22 = vmul.f32 %v2120_v60, %v1343_v44  ;;  %v1341_v10 = vsub.f32 %v3292_v23, %v2889_v62  ;;  %v2933_v62 = vmul.f32 0.125, %v757_v41  ;;  %v2947_v41 = vld [vmem:[%s3217_s3] ss:$0 sm:$0xff] }
 0x232   :  { %v1708_v28 = vmax.f32 %v1644_v17, 0.0  ;;  %v1605_v47 = vmul.f32 %v2614_v59, %v1534_v42  ;;  %v1122_v17 = vmul.f32 %v2914_v0, %v2914_v0 }
 0x233   :  { %v2122_v48 = vpop.eup %2121  ;;  %v1709_v46 = vmax.f32 %v1645_v53, 0.0  ;;  %v1606_v39 = vmul.f32 %v2614_v59, %v1535_v22 }
 0x234   :  { %v2124_v19 = vpop.eup %2123  ;;  %1772 = vst [vmem:[#allocation7 + $0x70] sm:$0xff] %v1708_v28  ;;  %v1676_v15 = vadd.f32 %v2621_v3, %v1605_v47  ;;  %v1500_v63 = vmul.f32 %v2122_v48, %v1308_v45  ;;  %v753_v24 = vpop.xlane.xlu0 %752  ;;  %v2938_v28 = vld [vmem:[%s3216_s2] ss:$0 sm:$0xff]  ;;  %v2941_v48 = vmul.f32 0.125, %v759_v16  ;;  %s2271_s2 = smov [#allocation7]  }
 0x235   :  { %v2918_v6 = vpop.xlane.xlu1 %754  ;;  %1773 = vst [vmem:[#allocation7 + $0x78] sm:$0xff] %v1709_v46  ;;  %v1677_v18 = vadd.f32 %v2621_v3, %v1606_v39  ;;  %v1501_v9 = vmul.f32 %v2124_v19, %v1309_v38  ;;  %v2950_v19 = vmul.f32 0.125, %v689_v50  ;;  %s1827_s3 = sshll.u32 %s2271_s2, 4  ;;  %s1828_s3 = int_to_ptr.vmem [resolvable:$true] %s1827_s3 }
 0x236   :  { %v1740_v52 = vmax.f32 %v1676_v15, 0.0  ;;  %v1571_v43 = vmul.f32 %v2614_v59, %v1500_v63  ;;  %v2952_v15 = vmul.f32 0.125, %v691_v8  ;;  %s2239_s21 = scalar_lea.vmem %s1828_s3, 8192  ;;  %p2244_p3 = scmp.lt.s32.totalorder %s1828_s3, %s1828_s3 }
 0x237   :  { %v2126_v51 = vpop.eup %2125  ;;  %v1741_v2 = vmax.f32 %v1677_v18, 0.0  ;;  %v1572_v21 = vmul.f32 %v2614_v59, %v1501_v9  ;;  %v1154_v9 = vmul.f32 %v2933_v62, %v2933_v62  ;;  %p2240_p2 = scmp.ne.s32.totalorder %s1828_s3, %s2239_s21  ;;  %p2245_p4 = scmp.lt.s32.totalorder %s2239_s21, %s2239_s21 }
 0x238   :  { %v2128_v44 = vpop.eup %2127  ;;  %1804 = vst [vmem:[#allocation7 + $0x170] sm:$0xff] %v1740_v52  ;;  %v1642_v56 = vadd.f32 %v2621_v3, %v1571_v43  ;;  %v1532_v60 = vmul.f32 %v2126_v51, %v1340_v49  ;;  %v885_v42 = vpop.xlane.xlu0 %884  ;;  %v1155_v51 = vmul.f32 %v2941_v48, %v2941_v48 }
 0x239   :  { %1805 = vst [vmem:[#allocation7 + $0x178] sm:$0xff] %v1741_v2  ;;  %v1643_v53 = vadd.f32 %v2621_v3, %v1572_v21  ;;  %v1533_v22 = vmul.f32 %v2128_v44, %v1341_v10  ;;  %v1058_v20 = vmul.f32 0.125, %v885_v42  ;;  %v887_v59 = vpop.xlane.xlu1 %886  ;;  %v1120_v21 = vmul.f32 %v2950_v19, %v2950_v19  ;;  %p2246_p5 = por %p2245_p4, %p2244_p3 }
 0x23a   :  { %v1706_v45 = vmax.f32 %v1642_v56, 0.0  ;;  %v1603_v47 = vmul.f32 %v2938_v28, %v1532_v60  ;;  %v1059_v14 = vmul.f32 0.125, %v887_v59  ;;  %v1121_v44 = vmul.f32 %v2952_v15, %v2952_v15 }
 0x23b   :  { %v1707_v38 = vmax.f32 %v1643_v53, 0.0  ;;  %v1604_v46 = vmul.f32 %v2938_v28, %v1533_v22  ;;  %v1186_v3 = vsub.f32 %v1058_v20, %v1122_v17  ;;  %v2966_v20 = vmul.f32 0.125, %v2918_v6  ;;  %p2247_p6 = pnand %p2246_p5, %p2240_p2 }
 0x23c   :  { %1770 = vst [vmem:[#allocation7 + $0x60] sm:$0xff] %v1706_v45  ;;  %v1674_v39 = vadd.f32 %v2947_v41, %v1603_v47  ;;  %v1187_v63 = vsub.f32 %v1059_v14, %v1123_v7  ;;  %v949_v16 = vpop.xlane.xlu0 %948  ;;  %v2963_v7 = vmul.f32 0.125, %v753_v24 }
 0x23d   :  { %1771 = vst [vmem:[#allocation7 + $0x68] sm:$0xff] %v1707_v38  ;;  %v1675_v18 = vadd.f32 %v2947_v41, %v1604_v46  ;;  %v1250_v11 = vmax.f32 %v1186_v3, 0.0  ;;  %v1090_v49 = vmul.f32 0.125, %v949_v16  ;;  %v951_v52 = vpop.xlane.xlu1 %950 }
 0x23e   :  { %v1738_v43 = vmax.f32 %v1674_v39, 0.0  ;;  %v1251_v23 = vmax.f32 %v1187_v63, 0.0  ;;  %v1091_v50 = vmul.f32 0.125, %v951_v52  ;;  %v1152_v39 = vmul.f32 %v2963_v7, %v2963_v7 }
 0x23f   :  { %v1739_v10 = vmax.f32 %v1675_v18, 0.0  ;;  %v1378_v8 = vadd.f32 1e-06, %v1250_v11  ;;  %v1218_v2 = vsub.f32 %v1090_v49, %v1154_v9  ;;  %v1153_v18 = vmul.f32 %v2966_v20, %v2966_v20 }
 0x240   :  { %1802 = vst [vmem:[#allocation7 + $0x160] sm:$0xff] %v1738_v43  ;;  %v1379_v56 = vadd.f32 1e-06, %v1251_v23  ;;  %v1219_v60 = vsub.f32 %v1091_v50, %v1155_v51  ;;  %v881_v17 = vpop.xlane.xlu0 %880 }
 0x241   :  { %1803 = vst [vmem:[#allocation7 + $0x168] sm:$0xff] %v1739_v10  ;;  %2129 = vrsqrt.f32 %v1378_v8  ;;  %v1282_v42 = vmax.f32 %v1218_v2, 0.0  ;;  %v1056_v53 = vmul.f32 0.125, %v881_v17  ;;  %v883_v22 = vpop.xlane.xlu1 %882  ;;  %v3293_v10 = vld [vmem:[#allocation27_spill] sm:$0xff] }
 0x242   :  { %2131 = vrsqrt.f32 %v1379_v56  ;;  %v1283_v59 = vmax.f32 %v1219_v60, 0.0  ;;  %v1057_v45 = vmul.f32 0.125, %v883_v22  ;;  %v1314_v8 = vsub.f32 %v3293_v10, %v2914_v0 }
 0x243   :  { %v1410_v47 = vadd.f32 1e-06, %v1282_v42  ;;  %v1184_v14 = vsub.f32 %v1056_v53, %v1120_v21 }
 0x244   :  { %v1411_v38 = vadd.f32 1e-06, %v1283_v59  ;;  %v1185_v46 = vsub.f32 %v1057_v45, %v1121_v44  ;;  %v945_v3 = vpop.xlane.xlu0 %944  ;;  %v3294_v44 = vld [vmem:[#allocation31_spill] sm:$0xff] }
 0x245   :  { %2133 = vrsqrt.f32 %v1410_v47  ;;  %v1248_v24 = vmax.f32 %v1184_v14, 0.0  ;;  %v1088_v63 = vmul.f32 0.125, %v945_v3  ;;  %v947_v16 = vpop.xlane.xlu1 %946  ;;  %v1315_v56 = vsub.f32 %v3294_v44, %v2916_v55  ;;  %v3295_v47 = vld [vmem:[#allocation28_spill] sm:$0xff] }
 0x246   :  { %2135 = vrsqrt.f32 %v1411_v38  ;;  %v1249_v6 = vmax.f32 %v1185_v46, 0.0  ;;  %v1089_v9 = vmul.f32 0.125, %v947_v16  ;;  %v1346_v14 = vsub.f32 %v3295_v47, %v2933_v62  ;;  %v3296_v46 = vld [vmem:[#allocation32_spill] sm:$0xff]  ;;  %v3297_v62 = vld [vmem:[#allocation29_spill] sm:$0xff] }
 0x247   :  { %v1376_v11 = vadd.f32 1e-06, %v1248_v24  ;;  %v1216_v49 = vsub.f32 %v1088_v63, %v1152_v39  ;;  %v1347_v3 = vsub.f32 %v3296_v46, %v2941_v48  ;;  %v3298_v48 = vld [vmem:[#allocation33_spill] sm:$0xff] }
 0x248   :  { %v1377_v52 = vadd.f32 1e-06, %v1249_v6  ;;  %v1217_v43 = vsub.f32 %v1089_v9, %v1153_v18  ;;  %v701_v51 = vpop.xlane.xlu0 %700 }
 0x249   :  { %2137 = vrsqrt.f32 %v1376_v11  ;;  %v1280_v23 = vmax.f32 %v1216_v49, 0.0  ;;  %v703_v50 = vpop.xlane.xlu1 %702  ;;  %v1312_v11 = vsub.f32 %v3297_v62, %v2950_v19 }
 0x24a   :  { %2139 = vrsqrt.f32 %v1377_v52  ;;  %v1281_v2 = vmax.f32 %v1217_v43, 0.0 }
 0x24b   :  { %v2130_v21 = vpop.eup %2129  ;;  %v1408_v60 = vadd.f32 1e-06, %v1280_v23  ;;  %v1313_v23 = vsub.f32 %v3298_v48, %v2952_v15  ;;  %v3299_v15 = vld [vmem:[#allocation30_spill] sm:$0xff] }
 0x24c   :  { %v2132_v17 = vpop.eup %2131  ;;  %v1506_v42 = vmul.f32 %v2130_v21, %v1314_v8  ;;  %v1409_v53 = vadd.f32 1e-06, %v1281_v2  ;;  %v765_v22 = vpop.xlane.xlu0 %764 }
 0x24d   :  { %v1507_v59 = vmul.f32 %v2132_v17, %v1315_v56  ;;  %2141 = vrsqrt.f32 %v1408_v60  ;;  %v767_v45 = vpop.xlane.xlu1 %766  ;;  %v2991_v56 = vmul.f32 0.125, %v701_v51  ;;  %v2993_v60 = vmul.f32 0.125, %v703_v50 }
 0x24e   :  { %v1577_v38 = vmul.f32 %v2938_v28, %v1506_v42  ;;  %2143 = vrsqrt.f32 %v1409_v53 }
 0x24f   :  { %v2134_v0 = vpop.eup %2133  ;;  %v1578_v55 = vmul.f32 %v2938_v28, %v1507_v59  ;;  %v1344_v59 = vsub.f32 %v3299_v15, %v2963_v7  ;;  %v1127_v7 = vmul.f32 %v2993_v60, %v2993_v60 }
 0x250   :  { %v2136_v39 = vpop.eup %2135  ;;  %v1648_v24 = vadd.f32 %v2947_v41, %v1577_v38  ;;  %v1538_v63 = vmul.f32 %v2134_v0, %v1346_v14  ;;  %v697_v16 = vpop.xlane.xlu0 %696  ;;  %v3300_v0 = vld [vmem:[#allocation34_spill] sm:$0xff] }
 0x251   :  { %v1649_v18 = vadd.f32 %v2947_v41, %v1578_v55  ;;  %v1539_v6 = vmul.f32 %v2136_v39, %v1347_v3  ;;  %v699_v9 = vpop.xlane.xlu1 %698  ;;  %v1345_v46 = vsub.f32 %v3300_v0, %v2966_v20  ;;  %v3008_v20 = vmul.f32 0.125, %v765_v22 }
 0x252   :  { %v1712_v49 = vmax.f32 %v1648_v24, 0.0  ;;  %v1609_v52 = vmul.f32 %v2938_v28, %v1538_v63  ;;  %v1126_v24 = vmul.f32 %v2991_v56, %v2991_v56 }
 0x253   :  { %v2138_v43 = vpop.eup %2137  ;;  %v1713_v10 = vmax.f32 %v1649_v18, 0.0  ;;  %v1610_v8 = vmul.f32 %v2938_v28, %v1539_v6 }
 0x254   :  { %v2140_v2 = vpop.eup %2139  ;;  %1776 = vst [vmem:[#allocation7 + $0x90] sm:$0xff] %v1712_v49  ;;  %v1680_v21 = vadd.f32 %v2947_v41, %v1609_v52  ;;  %v1504_v44 = vmul.f32 %v2138_v43, %v1312_v11  ;;  %v761_v19 = vpop.xlane.xlu0 %760  ;;  %v3011_v43 = vmul.f32 0.125, %v767_v45  ;;  %v1158_v45 = vmul.f32 %v3008_v20, %v3008_v20 }
 0x255   :  { %1777 = vst [vmem:[#allocation7 + $0x98] sm:$0xff] %v1713_v10  ;;  %v1681_v17 = vadd.f32 %v2947_v41, %v1610_v8  ;;  %v1505_v42 = vmul.f32 %v2140_v2, %v1313_v23  ;;  %v763_v53 = vpop.xlane.xlu1 %762 }
 0x256   :  { %v1744_v47 = vmax.f32 %v1680_v21, 0.0  ;;  %v1575_v14 = vmul.f32 %v2938_v28, %v1504_v44  ;;  %v3015_v21 = vmul.f32 0.125, %v697_v16  ;;  %v3017_v44 = vmul.f32 0.125, %v699_v9 }
 0x257   :  { %v2142_v38 = vpop.eup %2141  ;;  %v1745_v51 = vmax.f32 %v1681_v17, 0.0  ;;  %v1576_v50 = vmul.f32 %v2938_v28, %v1505_v42 }
 0x258   :  { %v2144_v3 = vpop.eup %2143  ;;  %1808 = vst [vmem:[#allocation7 + $0x190] sm:$0xff] %v1744_v47  ;;  %v1646_v55 = vadd.f32 %v2947_v41, %v1575_v14  ;;  %v1536_v39 = vmul.f32 %v2142_v38, %v1344_v59  ;;  %v893_v63 = vpop.xlane.xlu0 %892  ;;  %v1159_v38 = vmul.f32 %v3011_v43, %v3011_v43 }
 0x259   :  { %1809 = vst [vmem:[#allocation7 + $0x198] sm:$0xff] %v1745_v51  ;;  %v1647_v18 = vadd.f32 %v2947_v41, %v1576_v50  ;;  %v1537_v6 = vmul.f32 %v2144_v3, %v1345_v46  ;;  %v1062_v62 = vmul.f32 0.125, %v893_v63  ;;  %v895_v11 = vpop.xlane.xlu1 %894  ;;  %v1124_v50 = vmul.f32 %v3015_v21, %v3015_v21 }
 0x25a   :  { %v1710_v49 = vmax.f32 %v1646_v55, 0.0  ;;  %v1607_v52 = vmul.f32 %v2938_v28, %v1536_v39  ;;  %v1063_v48 = vmul.f32 0.125, %v895_v11  ;;  %v1125_v3 = vmul.f32 %v3017_v44, %v3017_v44 }
 0x25b   :  { %v1711_v23 = vmax.f32 %v1647_v18, 0.0  ;;  %v1608_v10 = vmul.f32 %v2938_v28, %v1537_v6  ;;  %v1190_v8 = vsub.f32 %v1062_v62, %v1126_v24  ;;  %v3030_v62 = vmul.f32 0.125, %v763_v53 }
 0x25c   :  { %1774 = vst [vmem:[#allocation7 + $0x80] sm:$0xff] %v1710_v49  ;;  %v1678_v2 = vadd.f32 %v2947_v41, %v1607_v52  ;;  %v1191_v22 = vsub.f32 %v1063_v48, %v1127_v7  ;;  %v957_v17 = vpop.xlane.xlu0 %956  ;;  %v3028_v7 = vmul.f32 0.125, %v761_v19 }
 0x25d   :  { %1775 = vst [vmem:[#allocation7 + $0x88] sm:$0xff] %v1711_v23  ;;  %v1679_v42 = vadd.f32 %v2947_v41, %v1608_v10  ;;  %v1254_v15 = vmax.f32 %v1190_v8, 0.0  ;;  %v1094_v59 = vmul.f32 0.125, %v957_v17  ;;  %v959_v47 = vpop.xlane.xlu1 %958 }
 0x25e   :  { %v1742_v14 = vmax.f32 %v1678_v2, 0.0  ;;  %v1255_v0 = vmax.f32 %v1191_v22, 0.0  ;;  %v1095_v16 = vmul.f32 0.125, %v959_v47  ;;  %v1156_v2 = vmul.f32 %v3028_v7, %v3028_v7 }
 0x25f   :  { %v1743_v46 = vmax.f32 %v1679_v42, 0.0  ;;  %v1382_v9 = vadd.f32 1e-06, %v1254_v15  ;;  %v1222_v51 = vsub.f32 %v1094_v59, %v1158_v45  ;;  %v1157_v42 = vmul.f32 %v3030_v62, %v3030_v62 }
 0x260   :  { %1806 = vst [vmem:[#allocation7 + $0x180] sm:$0xff] %v1742_v14  ;;  %v1383_v55 = vadd.f32 1e-06, %v1255_v0  ;;  %v1223_v39 = vsub.f32 %v1095_v16, %v1159_v38  ;;  %v889_v24 = vpop.xlane.xlu0 %888 }
 0x261   :  { %1807 = vst [vmem:[#allocation7 + $0x188] sm:$0xff] %v1743_v46  ;;  %2145 = vrsqrt.f32 %v1382_v9  ;;  %v1286_v63 = vmax.f32 %v1222_v51, 0.0  ;;  %v1060_v18 = vmul.f32 0.125, %v889_v24  ;;  %v891_v6 = vpop.xlane.xlu1 %890  ;;  %v3301_v46 = vld [vmem:[#allocation35_spill] sm:$0xff] }
 0x262   :  { %2147 = vrsqrt.f32 %v1383_v55  ;;  %v1287_v11 = vmax.f32 %v1223_v39, 0.0  ;;  %v1061_v49 = vmul.f32 0.125, %v891_v6  ;;  %v1318_v9 = vsub.f32 %v3301_v46, %v2991_v56 }
 0x263   :  { %v1414_v52 = vadd.f32 1e-06, %v1286_v63  ;;  %v1188_v48 = vsub.f32 %v1060_v18, %v1124_v50 }
 0x264   :  { %v1415_v23 = vadd.f32 1e-06, %v1287_v11  ;;  %v1189_v10 = vsub.f32 %v1061_v49, %v1125_v3  ;;  %v953_v8 = vpop.xlane.xlu0 %952  ;;  %v3302_v3 = vld [vmem:[#allocation36_spill] sm:$0xff] }
 0x265   :  { %2149 = vrsqrt.f32 %v1414_v52  ;;  %v1252_v19 = vmax.f32 %v1188_v48, 0.0  ;;  %v1092_v22 = vmul.f32 0.125, %v953_v8  ;;  %v955_v17 = vpop.xlane.xlu1 %954  ;;  %v1319_v55 = vsub.f32 %v3302_v3, %v2993_v60 }
 0x266   :  { %2151 = vrsqrt.f32 %v1415_v23  ;;  %v1253_v53 = vmax.f32 %v1189_v10, 0.0  ;;  %v1093_v45 = vmul.f32 0.125, %v955_v17  ;;  %v1350_v52 = vsub.f32 %v2433_v25, %v3008_v20 }
 0x267   :  { %v1380_v15 = vadd.f32 1e-06, %v1252_v19  ;;  %v1220_v59 = vsub.f32 %v1092_v22, %v1156_v2  ;;  %v1351_v23 = vsub.f32 %v2443_v29, %v3011_v43  ;;  %v1316_v25 = vsub.f32 %v2437_v26, %v3015_v21 }
 0x268   :  { %v1381_v47 = vadd.f32 1e-06, %v1253_v53  ;;  %v1221_v14 = vsub.f32 %v1093_v45, %v1157_v42  ;;  %v709_v38 = vpop.xlane.xlu0 %708  ;;  %v1317_v29 = vsub.f32 %v2445_v30, %v3017_v44  ;;  %v1348_v30 = vsub.f32 %v2439_v27, %v3028_v7 }
 0x269   :  { %2153 = vrsqrt.f32 %v1380_v15  ;;  %v1284_v0 = vmax.f32 %v1220_v59, 0.0  ;;  %v711_v16 = vpop.xlane.xlu1 %710 }
 0x26a   :  { %2155 = vrsqrt.f32 %v1381_v47  ;;  %v1285_v51 = vmax.f32 %v1221_v14, 0.0  ;;  %v3057_v46 = vmul.f32 0.125, %v711_v16 }
 0x26b   :  { %v2146_v50 = vpop.eup %2145  ;;  %v1412_v39 = vadd.f32 1e-06, %v1284_v0  ;;  %v3055_v0 = vmul.f32 0.125, %v709_v38 }
 0x26c   :  { %v2148_v24 = vpop.eup %2147  ;;  %v1510_v63 = vmul.f32 %v2146_v50, %v1318_v9  ;;  %v1413_v18 = vadd.f32 1e-06, %v1285_v51  ;;  %v773_v6 = vpop.xlane.xlu0 %772  ;;  %v1131_v27 = vmul.f32 %v3057_v46, %v3057_v46 }
 0x26d   :  { %v1511_v11 = vmul.f32 %v2148_v24, %v1319_v55  ;;  %2157 = vrsqrt.f32 %v1412_v39  ;;  %v775_v49 = vpop.xlane.xlu1 %774  ;;  %v1349_v55 = vsub.f32 %v2447_v31, %v3030_v62  ;;  %v3072_v31 = vmul.f32 0.125, %v773_v6 }
 0x26e   :  { %v1581_v48 = vmul.f32 %v2938_v28, %v1510_v63  ;;  %2159 = vrsqrt.f32 %v1413_v18  ;;  %v1130_v18 = vmul.f32 %v3055_v0, %v3055_v0 }
 0x26f   :  { %v2150_v56 = vpop.eup %2149  ;;  %v1582_v60 = vmul.f32 %v2938_v28, %v1511_v11 }
 0x270   :  { %v2152_v10 = vpop.eup %2151  ;;  %v1652_v8 = vadd.f32 %v2947_v41, %v1581_v48  ;;  %v1542_v2 = vmul.f32 %v2150_v56, %v1350_v52  ;;  %v705_v19 = vpop.xlane.xlu0 %704 }
 0x271   :  { %v1653_v22 = vadd.f32 %v2947_v41, %v1582_v60  ;;  %v1543_v17 = vmul.f32 %v2152_v10, %v1351_v23  ;;  %v707_v42 = vpop.xlane.xlu1 %706  ;;  %v3075_v60 = vmul.f32 0.125, %v775_v49  ;;  %v1162_v49 = vmul.f32 %v3072_v31, %v3072_v31 }
 0x272   :  { %v1716_v20 = vmax.f32 %v1652_v8, 0.0  ;;  %v1613_v53 = vmul.f32 %v2938_v28, %v1542_v2 }
 0x273   :  { %v2154_v45 = vpop.eup %2153  ;;  %v1717_v43 = vmax.f32 %v1653_v22, 0.0  ;;  %v1614_v15 = vmul.f32 %v2938_v28, %v1543_v17 }
 0x274   :  { %v2156_v59 = vpop.eup %2155  ;;  %1780 = vst [vmem:[#allocation7 + $0xb0] sm:$0xff] %v1716_v20  ;;  %v1684_v47 = vadd.f32 %v2947_v41, %v1613_v53  ;;  %v1508_v14 = vmul.f32 %v2154_v45, %v1316_v25  ;;  %v769_v26 = vpop.xlane.xlu0 %768  ;;  %v3079_v25 = vmul.f32 0.125, %v705_v19  ;;  %v3081_v20 = vmul.f32 0.125, %v707_v42 }
 0x275   :  { %1781 = vst [vmem:[#allocation7 + $0xb8] sm:$0xff] %v1717_v43  ;;  %v1685_v21 = vadd.f32 %v2947_v41, %v1614_v15  ;;  %v1509_v9 = vmul.f32 %v2156_v59, %v1317_v29  ;;  %v771_v51 = vpop.xlane.xlu1 %770 }
 0x276   :  { %v1748_v44 = vmax.f32 %v1684_v47, 0.0  ;;  %v1579_v50 = vmul.f32 %v2938_v28, %v1508_v14  ;;  %v1163_v47 = vmul.f32 %v3075_v60, %v3075_v60 }
 0x277   :  { %v2158_v3 = vpop.eup %2157  ;;  %v1749_v38 = vmax.f32 %v1685_v21, 0.0  ;;  %v1580_v16 = vmul.f32 %v2938_v28, %v1509_v9 }
 0x278   :  { %v2160_v39 = vpop.eup %2159  ;;  %1812 = vst [vmem:[#allocation7 + $0x1b0] sm:$0xff] %v1748_v44  ;;  %v1650_v24 = vadd.f32 %v2947_v41, %v1579_v50  ;;  %v1540_v63 = vmul.f32 %v2158_v3, %v1348_v30  ;;  %v901_v7 = vpop.xlane.xlu0 %900  ;;  %v1128_v30 = vmul.f32 %v3079_v25, %v3079_v25  ;;  %v1129_v44 = vmul.f32 %v3081_v20, %v3081_v20 }
 0x279   :  { %1813 = vst [vmem:[#allocation7 + $0x1b8] sm:$0xff] %v1749_v38  ;;  %v1651_v11 = vadd.f32 %v2947_v41, %v1580_v16  ;;  %v1541_v52 = vmul.f32 %v2160_v39, %v1349_v55  ;;  %v1066_v62 = vmul.f32 0.125, %v901_v7  ;;  %v903_v48 = vpop.xlane.xlu1 %902  ;;  %v3092_v38 = vmul.f32 0.125, %v769_v26 }
 0x27a   :  { %v1714_v56 = vmax.f32 %v1650_v24, 0.0  ;;  %v1611_v23 = vmul.f32 %v2938_v28, %v1540_v63  ;;  %v1067_v10 = vmul.f32 0.125, %v903_v48  ;;  %v3094_v63 = vmul.f32 0.125, %v771_v51 }
 0x27b   :  { %v1715_v8 = vmax.f32 %v1651_v11, 0.0  ;;  %v1612_v2 = vmul.f32 %v2938_v28, %v1541_v52  ;;  %v1194_v22 = vsub.f32 %v1066_v62, %v1130_v18 }
 0x27c   :  { %1778 = vst [vmem:[#allocation7 + $0xa0] sm:$0xff] %v1714_v56  ;;  %v1682_v17 = vadd.f32 %v2947_v41, %v1611_v23  ;;  %v1195_v6 = vsub.f32 %v1067_v10, %v1131_v27  ;;  %v965_v53 = vpop.xlane.xlu0 %964  ;;  %v1160_v56 = vmul.f32 %v3092_v38, %v3092_v38 }
 0x27d   :  { %1779 = vst [vmem:[#allocation7 + $0xa8] sm:$0xff] %v1715_v8  ;;  %v1683_v45 = vadd.f32 %v2947_v41, %v1612_v2  ;;  %v1258_v29 = vmax.f32 %v1194_v22, 0.0  ;;  %v1098_v43 = vmul.f32 0.125, %v965_v53  ;;  %v967_v15 = vpop.xlane.xlu1 %966  ;;  %v1161_v8 = vmul.f32 %v3094_v63, %v3094_v63 }
 0x27e   :  { %v1746_v59 = vmax.f32 %v1682_v17, 0.0  ;;  %v1259_v14 = vmax.f32 %v1195_v6, 0.0  ;;  %v1099_v19 = vmul.f32 0.125, %v967_v15 }
 0x27f   :  { %v1747_v21 = vmax.f32 %v1683_v45, 0.0  ;;  %v1386_v42 = vadd.f32 1e-06, %v1258_v29  ;;  %v1226_v9 = vsub.f32 %v1098_v43, %v1162_v49  ;;  %v1322_v43 = vsub.f32 %v2467_v54, %v3055_v0 }
 0x280   :  { %1810 = vst [vmem:[#allocation7 + $0x1a0] sm:$0xff] %v1746_v59  ;;  %v1387_v50 = vadd.f32 1e-06, %v1259_v14  ;;  %v1227_v3 = vsub.f32 %v1099_v19, %v1163_v47  ;;  %v897_v55 = vpop.xlane.xlu0 %896  ;;  %v1323_v47 = vsub.f32 %v2471_v58, %v3057_v46  ;;  %v1355_v58 = vsub.f32 %v2481_v12, %v3075_v60 }
 0x281   :  { %1811 = vst [vmem:[#allocation7 + $0x1a8] sm:$0xff] %v1747_v21  ;;  %2161 = vrsqrt.f32 %v1386_v42  ;;  %v1290_v16 = vmax.f32 %v1226_v9, 0.0  ;;  %v1064_v39 = vmul.f32 0.125, %v897_v55  ;;  %v899_v24 = vpop.xlane.xlu1 %898  ;;  %v1321_v12 = vsub.f32 %v2473_v1, %v3081_v20 }
 0x282   :  { %2163 = vrsqrt.f32 %v1387_v50  ;;  %v1291_v18 = vmax.f32 %v1227_v3, 0.0  ;;  %v1065_v27 = vmul.f32 0.125, %v899_v24  ;;  %v1354_v50 = vsub.f32 %v2475_v4, %v3072_v31 }
 0x283   :  { %v1418_v7 = vadd.f32 1e-06, %v1290_v16  ;;  %v1192_v11 = vsub.f32 %v1064_v39, %v1128_v30  ;;  %v1320_v4 = vsub.f32 %v2469_v57, %v3079_v25 }
 0x284   :  { %v1419_v52 = vadd.f32 1e-06, %v1291_v18  ;;  %v1193_v62 = vsub.f32 %v1065_v27, %v1129_v44  ;;  %v961_v48 = vpop.xlane.xlu0 %960 }
 0x285   :  { %2165 = vrsqrt.f32 %v1418_v7  ;;  %v1256_v26 = vmax.f32 %v1192_v11, 0.0  ;;  %v1096_v23 = vmul.f32 0.125, %v961_v48  ;;  %v963_v10 = vpop.xlane.xlu1 %962 }
 0x286   :  { %2167 = vrsqrt.f32 %v1419_v52  ;;  %v1257_v51 = vmax.f32 %v1193_v62, 0.0  ;;  %v1097_v2 = vmul.f32 0.125, %v963_v10 }
 0x287   :  { %v1384_v22 = vadd.f32 1e-06, %v1256_v26  ;;  %v1224_v17 = vsub.f32 %v1096_v23, %v1160_v56 }
 0x288   :  { %v1385_v6 = vadd.f32 1e-06, %v1257_v51  ;;  %v1225_v53 = vsub.f32 %v1097_v2, %v1161_v8  ;;  %v717_v45 = vpop.xlane.xlu0 %716  ;;  %v1352_v8 = vsub.f32 %v2479_v5, %v3092_v38 }
 0x289   :  { %2169 = vrsqrt.f32 %v1384_v22  ;;  %v1288_v49 = vmax.f32 %v1224_v17, 0.0  ;;  %v719_v29 = vpop.xlane.xlu1 %718  ;;  %v3124_v25 = vmul.f32 0.125, %v717_v45  ;;  %v1353_v22 = vsub.f32 %v2483_v13, %v3094_v63 }
 0x28a   :  { %2171 = vrsqrt.f32 %v1385_v6  ;;  %v1289_v15 = vmax.f32 %v1225_v53, 0.0  ;;  %v3129_v51 = vmul.f32 0.125, %v719_v29 }
 0x28b   :  { %v2162_v59 = vpop.eup %2161  ;;  %v1416_v14 = vadd.f32 1e-06, %v1288_v49  ;;  %v1134_v13 = vmul.f32 %v3124_v25, %v3124_v25 }
 0x28c   :  { %v2164_v19 = vpop.eup %2163  ;;  %v1514_v21 = vmul.f32 %v2162_v59, %v1322_v43  ;;  %v1417_v42 = vadd.f32 1e-06, %v1289_v15  ;;  %v3104_v9 = vpop.xlane.xlu0 %780 }
 0x28d   :  { %v1515_v30 = vmul.f32 %v2164_v19, %v1323_v47  ;;  %2173 = vrsqrt.f32 %v1416_v14  ;;  %v3106_v44 = vpop.xlane.xlu1 %782  ;;  %v1135_v19 = vmul.f32 %v3129_v51, %v3129_v51 }
 0x28e   :  { %v1585_v54 = vmul.f32 %v2938_v28, %v1514_v21  ;;  %2175 = vrsqrt.f32 %v1417_v42 }
 0x28f   :  { %v2166_v0 = vpop.eup %2165  ;;  %v1586_v46 = vmul.f32 %v2938_v28, %v1515_v30 }
 0x290   :  { %v2168_v3 = vpop.eup %2167  ;;  %v1656_v55 = vadd.f32 %v2947_v41, %v1585_v54  ;;  %v1546_v16 = vmul.f32 %v2166_v0, %v1354_v50  ;;  %v713_v39 = vpop.xlane.xlu0 %712 }
 0x291   :  { %v1657_v24 = vadd.f32 %v2947_v41, %v1586_v46  ;;  %v1547_v18 = vmul.f32 %v2168_v3, %v1355_v58  ;;  %v715_v27 = vpop.xlane.xlu1 %714  ;;  %v3135_v43 = vmul.f32 0.125, %v713_v39 }
 0x292   :  { %v1720_v31 = vmax.f32 %v1656_v55, 0.0  ;;  %v1617_v7 = vmul.f32 %v2938_v28, %v1546_v16  ;;  %v3137_v5 = vmul.f32 0.125, %v715_v27 }
 0x293   :  { %v2170_v11 = vpop.eup %2169  ;;  %v1721_v60 = vmax.f32 %v1657_v24, 0.0  ;;  %v1618_v52 = vmul.f32 %v2938_v28, %v1547_v18  ;;  %v1132_v0 = vmul.f32 %v3135_v43, %v3135_v43 }
 0x294   :  { %v2172_v62 = vpop.eup %2171  ;;  %1784 = vst [vmem:[#allocation7 + $0xd0] sm:$0xff] %v1720_v31  ;;  %v1688_v48 = vadd.f32 %v2947_v41, %v1617_v7  ;;  %v1512_v56 = vmul.f32 %v2170_v11, %v1320_v4  ;;  %v777_v26 = vpop.xlane.xlu0 %776  ;;  %v1133_v58 = vmul.f32 %v3137_v5, %v3137_v5 }
 0x295   :  { %1785 = vst [vmem:[#allocation7 + $0xd8] sm:$0xff] %v1721_v60  ;;  %v1689_v23 = vadd.f32 %v2947_v41, %v1618_v52  ;;  %v1513_v57 = vmul.f32 %v2172_v62, %v1321_v12  ;;  %v779_v10 = vpop.xlane.xlu1 %778  ;;  %v3152_v16 = vmul.f32 0.125, %v777_v26  ;;  %v3157_v52 = vmul.f32 0.125, %v3104_v9 }
 0x296   :  { %v1752_v1 = vmax.f32 %v1688_v48, 0.0  ;;  %v1583_v20 = vmul.f32 %v2938_v28, %v1512_v56  ;;  %v3154_v4 = vmul.f32 0.125, %v779_v10  ;;  %v3160_v62 = vmul.f32 0.125, %v3106_v44 }
 0x297   :  { %v2174_v2 = vpop.eup %2173  ;;  %v1753_v17 = vmax.f32 %v1689_v23, 0.0  ;;  %v1584_v6 = vmul.f32 %v2938_v28, %v1513_v57  ;;  %v1164_v23 = vmul.f32 %v3152_v16, %v3152_v16 }
 0x298   :  { %v2176_v53 = vpop.eup %2175  ;;  %1816 = vst [vmem:[#allocation7 + $0x1d0] sm:$0xff] %v1752_v1  ;;  %v1654_v45 = vadd.f32 %v2947_v41, %v1583_v20  ;;  %v1544_v49 = vmul.f32 %v2174_v2, %v1352_v8  ;;  %v909_v38 = vpop.xlane.xlu0 %908  ;;  %v1165_v1 = vmul.f32 %v3154_v4, %v3154_v4 }
 0x299   :  { %1817 = vst [vmem:[#allocation7 + $0x1d8] sm:$0xff] %v1753_v17  ;;  %v1655_v29 = vadd.f32 %v2947_v41, %v1584_v6  ;;  %v1545_v15 = vmul.f32 %v2176_v53, %v1353_v22  ;;  %v1070_v63 = vmul.f32 0.125, %v909_v38  ;;  %v911_v59 = vpop.xlane.xlu1 %910  ;;  %v1166_v53 = vmul.f32 %v3157_v52, %v3157_v52 }
 0x29a   :  { %v1718_v47 = vmax.f32 %v1654_v45, 0.0  ;;  %v1615_v14 = vmul.f32 %v2938_v28, %v1544_v49  ;;  %v1071_v21 = vmul.f32 0.125, %v911_v59 }
 0x29b   :  { %v1719_v42 = vmax.f32 %v1655_v29, 0.0  ;;  %v1616_v30 = vmul.f32 %v2938_v28, %v1545_v15  ;;  %v1198_v50 = vsub.f32 %v1070_v63, %v1134_v13  ;;  %v1167_v29 = vmul.f32 %v3160_v62, %v3160_v62 }
 0x29c   :  { %1782 = vst [vmem:[#allocation7 + $0xc0] sm:$0xff] %v1718_v47  ;;  %v1686_v54 = vadd.f32 %v2947_v41, %v1615_v14  ;;  %v1199_v46 = vsub.f32 %v1071_v21, %v1135_v19  ;;  %v905_v3 = vpop.xlane.xlu0 %904  ;;  %v1326_v21 = vsub.f32 %v2507_v32, %v3124_v25  ;;  %v1325_v32 = vsub.f32 %v2513_v35, %v3137_v5 }
 0x29d   :  { %1783 = vst [vmem:[#allocation7 + $0xc8] sm:$0xff] %v1719_v42  ;;  %v1687_v55 = vadd.f32 %v2947_v41, %v1616_v30  ;;  %v1262_v39 = vmax.f32 %v1198_v50, 0.0  ;;  %v1068_v24 = vmul.f32 0.125, %v905_v3  ;;  %v907_v18 = vpop.xlane.xlu1 %906  ;;  %v1327_v50 = vsub.f32 %v2511_v34, %v3129_v51 }
 0x29e   :  { %v1750_v27 = vmax.f32 %v1686_v54, 0.0  ;;  %v1263_v31 = vmax.f32 %v1199_v46, 0.0  ;;  %v1069_v7 = vmul.f32 0.125, %v907_v18 }
 0x29f   :  { %v1751_v11 = vmax.f32 %v1687_v55, 0.0  ;;  %v1390_v12 = vadd.f32 1e-06, %v1262_v39  ;;  %v1196_v60 = vsub.f32 %v1068_v24, %v1132_v0  ;;  %v1324_v55 = vsub.f32 %v2509_v33, %v3135_v43 }
 0x2a0   :  { %1814 = vst [vmem:[#allocation7 + $0x1c0] sm:$0xff] %v1750_v27  ;;  %v1391_v48 = vadd.f32 1e-06, %v1263_v31  ;;  %v1197_v56 = vsub.f32 %v1069_v7, %v1133_v58  ;;  %v969_v26 = vpop.xlane.xlu0 %968  ;;  %v1356_v7 = vsub.f32 %v3275_v40, %v3152_v16  ;;  %v1358_v40 = vsub.f32 %v2515_v61, %v3157_v52 }
 0x2a1   :  { %1815 = vst [vmem:[#allocation7 + $0x1c8] sm:$0xff] %v1751_v11  ;;  %2177 = vrsqrt.f32 %v1390_v12  ;;  %v1260_v57 = vmax.f32 %v1196_v60, 0.0  ;;  %v1100_v10 = vmul.f32 0.125, %v969_v26  ;;  %v971_v8 = vpop.xlane.xlu1 %970  ;;  %v1357_v12 = vsub.f32 %v3276_v36, %v3154_v4 }
 0x2a2   :  { %2179 = vrsqrt.f32 %v1391_v48  ;;  %v1261_v9 = vmax.f32 %v1197_v56, 0.0  ;;  %v1101_v20 = vmul.f32 0.125, %v971_v8  ;;  %v1359_v36 = vsub.f32 %v2521_v37, %v3160_v62 }
 0x2a3   :  { %v1388_v2 = vadd.f32 1e-06, %v1260_v57  ;;  %v1228_v44 = vsub.f32 %v1100_v10, %v1164_v23 }
 0x2a4   :  { %v1389_v22 = vadd.f32 1e-06, %v1261_v9  ;;  %v1229_v17 = vsub.f32 %v1101_v20, %v1165_v1  ;;  %v973_v6 = vpop.xlane.xlu0 %972 }
 0x2a5   :  { %2181 = vrsqrt.f32 %v1388_v2  ;;  %v1292_v45 = vmax.f32 %v1228_v44, 0.0  ;;  %v1102_v49 = vmul.f32 0.125, %v973_v6  ;;  %v975_v38 = vpop.xlane.xlu1 %974 }
 0x2a6   :  { %2183 = vrsqrt.f32 %v1389_v22  ;;  %v1293_v15 = vmax.f32 %v1229_v17, 0.0  ;;  %v1103_v13 = vmul.f32 0.125, %v975_v38 }
 0x2a7   :  { %v1420_v63 = vadd.f32 1e-06, %v1292_v45  ;;  %v1230_v59 = vsub.f32 %v1102_v49, %v1166_v53 }
 0x2a8   :  { %v1421_v47 = vadd.f32 1e-06, %v1293_v15  ;;  %v1231_v14 = vsub.f32 %v1103_v13, %v1167_v29 }
 0x2a9   :  { %2185 = vrsqrt.f32 %v1420_v63  ;;  %v1294_v19 = vmax.f32 %v1230_v59, 0.0 }
 0x2aa   :  { %2187 = vrsqrt.f32 %v1421_v47  ;;  %v1295_v42 = vmax.f32 %v1231_v14, 0.0 }
 0x2ab   :  { %v2178_v30 = vpop.eup %2177  ;;  %v1422_v54 = vadd.f32 1e-06, %v1294_v19 }
 0x2ac   :  { %v2180_v0 = vpop.eup %2179  ;;  %v1518_v58 = vmul.f32 %v2178_v30, %v1326_v21  ;;  %v1423_v46 = vadd.f32 1e-06, %v1295_v42 }
 0x2ad   :  { %v1519_v3 = vmul.f32 %v2180_v0, %v1327_v50  ;;  %2189 = vrsqrt.f32 %v1422_v54 }
 0x2ae   :  { %v1589_v39 = vmul.f32 %v2938_v28, %v1518_v58  ;;  %2191 = vrsqrt.f32 %v1423_v46 }
 0x2af   :  { %v2182_v24 = vpop.eup %2181  ;;  %v1590_v25 = vmul.f32 %v2938_v28, %v1519_v3 }
 0x2b0   :  { %v2184_v18 = vpop.eup %2183  ;;  %v1660_v34 = vadd.f32 %v2947_v41, %v1589_v39  ;;  %v1516_v51 = vmul.f32 %v2182_v24, %v1324_v55 }
 0x2b1   :  { %v1661_v27 = vadd.f32 %v2947_v41, %v1590_v25  ;;  %v1517_v31 = vmul.f32 %v2184_v18, %v1325_v32 }
 0x2b2   :  { %v1724_v33 = vmax.f32 %v1660_v34, 0.0  ;;  %v1587_v43 = vmul.f32 %v2938_v28, %v1516_v51 }
 0x2b3   :  { %v2186_v11 = vpop.eup %2185  ;;  %v1725_v35 = vmax.f32 %v1661_v27, 0.0  ;;  %v1588_v5 = vmul.f32 %v2938_v28, %v1517_v31 }
 0x2b4   :  { %v2188_v60 = vpop.eup %2187  ;;  %1788 = vst [vmem:[#allocation7 + $0xf0] sm:$0xff] %v1724_v33  ;;  %v1658_v48 = vadd.f32 %v2947_v41, %v1587_v43  ;;  %v1548_v56 = vmul.f32 %v2186_v11, %v1356_v7 }
 0x2b5   :  { %1789 = vst [vmem:[#allocation7 + $0xf8] sm:$0xff] %v1725_v35  ;;  %v1659_v26 = vadd.f32 %v2947_v41, %v1588_v5  ;;  %v1549_v23 = vmul.f32 %v2188_v60, %v1357_v12 }
 0x2b6   :  { %v1722_v16 = vmax.f32 %v1658_v48, 0.0  ;;  %v1619_v57 = vmul.f32 %v2938_v28, %v1548_v56 }
 0x2b7   :  { %v2190_v10 = vpop.eup %2189  ;;  %v1723_v4 = vmax.f32 %v1659_v26, 0.0  ;;  %v1620_v8 = vmul.f32 %v2938_v28, %v1549_v23 }
 0x2b8   :  { %v2192_v1 = vpop.eup %2191  ;;  %1786 = vst [vmem:[#allocation7 + $0xe0] sm:$0xff] %v1722_v16  ;;  %v1690_v9 = vadd.f32 %v2947_v41, %v1619_v57  ;;  %v1550_v20 = vmul.f32 %v2190_v10, %v1358_v40 }
 0x2b9   :  { %1787 = vst [vmem:[#allocation7 + $0xe8] sm:$0xff] %v1723_v4  ;;  %v1691_v2 = vadd.f32 %v2947_v41, %v1620_v8  ;;  %v1551_v44 = vmul.f32 %v2192_v1, %v1359_v36 }
 0x2ba   :  { %v1754_v61 = vmax.f32 %v1690_v9, 0.0  ;;  %v1621_v52 = vmul.f32 %v2938_v28, %v1550_v20 }
 0x2bb   :  { %v1755_v22 = vmax.f32 %v1691_v2, 0.0  ;;  %v1622_v17 = vmul.f32 %v2938_v28, %v1551_v44 }
 0x2bc   :  { %1818 = vst [vmem:[#allocation7 + $0x1e0] sm:$0xff] %v1754_v61  ;;  %v1692_v37 = vadd.f32 %v2947_v41, %v1621_v52 }
 0x2bd   :  { %1819 = vst [vmem:[#allocation7 + $0x1e8] sm:$0xff] %v1755_v22  ;;  %v1693_v62 = vadd.f32 %v2947_v41, %v1622_v17 }
 0x2be   :  { %v1756_v6 = vmax.f32 %v1692_v37, 0.0 }
 0x2bf   :  { %v1757_v53 = vmax.f32 %v1693_v62, 0.0 }
 0x2c0   :  { %1820 = vst [vmem:[#allocation7 + $0x1f0] sm:$0xff] %v1756_v6 }
 0x2c1   :  { %1821 = vst [vmem:[#allocation7 + $0x1f8] sm:$0xff] %v1757_v53 }
 0x2c2   :  { %2250 = shalt.err (!%p2247_p6)
}
 0x2c3   :  { %s2251_s24 = scalar_lea.hbm %s3218_s4, 8192 }
 0x2c4   :  { %p2252_p7 = scmp.ne.s32.totalorder %s3218_s4, %s2251_s24  ;;  %p2255_p8 = scmp.lt.u32.totalorder %s2251_s24, %s3218_s4 }
 0x2c6   :  { %p2257_p9 = pnand %p2255_p8, %p2252_p7 }
 0x2c8   :  { %2260 = shalt.err (!%p2257_p9)
}
 0x2c9   :  { %s2272_s29 = smov 128   ;;  %s2273_s30 = smov 8  }
 0x2ca   :  { %1833 = dma.vmem_to_hbm [thread:$0]  %s1828_s3, 8192, %s3218_s4, [#allocation4], %s2272_s29, %s2272_s29, %s2273_s30  }
 0x2cb   :  { %2265 = dma.done.wait [#allocation4], 8192  }
 0x2cc   :  { %2266 = vsyncadd [#allocation4], 4294959104 }
 0x2cd   :  { %1837 = vsyncpa [#allocation3], 1 }
 0x2ce   :  { %1838 = vsyncpa [#allocation6], 1 }
 0x2cf   :  { %1839 = vsyncpa [#allocation4], 1 }

</bundles_post_ra>
